<compile_context>
chip_gen: v7x
topology: tpu7x:2x2x1
jax: 0.10.0
libtpu: 0.0.40
codegen_flags: <defaults>
</compile_context>

<pallas_src>
import functools

import jax
import jax.numpy as jnp
from jax.experimental import pallas as pl
from jax.experimental.pallas import tpu as pltpu

HIDDEN = 4096  # fixed by nn.Linear(4096, 1) in the module


def _reward_head_kernel(h_ref, w_ref, b_ref, o_ref, acc_ref, *, inv_seq_len):
    """Sequence-mean + linear(4096->1) + sigmoid, streamed over the seq axis.

    h_ref  : (b_tile, s_tile, H) VMEM  hidden-state tile (f32 or bf16)
    w_ref  : (H, 1)              VMEM  linear weight (whole, resident)
    b_ref  : (1,)                SMEM  linear bias (scalar)
    o_ref  : (b_tile, 1)         VMEM  sigmoid score output block
    acc_ref: (b_tile, H)         VMEM  f32 running sequence-sum accumulator
    """
    s = pl.program_id(1)

    @pl.when(s == 0)
    def _init():
        acc_ref[...] = jnp.zeros_like(acc_ref)

    # Partial sequence sum on the VPU; always accumulate in f32 (safe even if
    # the upstream LLM hands us bf16 hidden states).
    h = h_ref[...].astype(jnp.float32)            # (b_tile, s_tile, H)
    acc_ref[...] += jnp.sum(h, axis=1)            # (b_tile, H)

    @pl.when(s == pl.num_programs(1) - 1)
    def _finalize():
        # One tiny N=1 matmul per batch tile; 1/S scale + bias applied on the
        # (b_tile, 1) scalars, not per-element in the streamed loop.
        score = jnp.dot(acc_ref[...], w_ref[...],
                        preferred_element_type=jnp.float32)   # (b_tile, 1)
        score = score * inv_seq_len + b_ref[0]
        o_ref[...] = jax.nn.sigmoid(score).astype(o_ref.dtype)


def reward_model_head(last_hidden_state, weight, bias, *, b_tile=None, s_tile=128):
    """last_hidden_state: (B, S, H) f32/bf16; weight: (H, 1) f32; bias: (1,) f32."""
    B, S, H = last_hidden_state.shape
    assert H == HIDDEN, f"hidden dim must be {HIDDEN} (nn.Linear(4096, 1))"

    # Tile choices: full batch per block when B is small, otherwise blocks of 8
    # (keeps the (8, 128) sublane rule happy for the (b_tile, 1) output block).
    if b_tile is None:
        b_tile = B if B < 8 else 8
    b_tile = min(b_tile, B)
    s_tile = min(s_tile, S)
    assert B % b_tile == 0, "batch must be divisible by b_tile"
    assert S % s_tile == 0, "sequence length must be divisible by s_tile"
    n_b = B // b_tile
    n_s = S // s_tile

    itemsize = jnp.dtype(last_hidden_state.dtype).itemsize
    cost = pl.CostEstimate(
        flops=2 * B * S * H + 2 * B * H,
        transcendentals=B,                                    # sigmoid
        bytes_accessed=B * S * H * itemsize + H * 4 + B * 4,  # bandwidth-bound
    )

    kernel = functools.partial(_reward_head_kernel, inv_seq_len=1.0 / float(S))

    return pl.pallas_call(
        kernel,
        out_shape=jax.ShapeDtypeStruct((B, 1), jnp.float32),
        grid_spec=pltpu.PrefetchScalarGridSpec(
            num_scalar_prefetch=0,
            grid=(n_b, n_s),                                  # reduction axis last
            in_specs=[
                # Streamed hidden-state tiles (double-buffered by Pallas).
                pl.BlockSpec((b_tile, s_tile, HIDDEN), lambda b, s: (b, s, 0)),
                # Tiny weight, constant block index -> fetched once, resident.
                pl.BlockSpec((HIDDEN, 1), lambda b, s: (0, 0)),
                # Scalar bias lives in SMEM.
                pl.BlockSpec(memory_space=pltpu.MemorySpace.SMEM),
            ],
            out_specs=pl.BlockSpec((b_tile, 1), lambda b, s: (b, 0)),
            scratch_shapes=[pltpu.VMEM((b_tile, HIDDEN), jnp.float32)],
        ),
        compiler_params=pltpu.CompilerParams(
            dimension_semantics=("parallel", "arbitrary"),
            vmem_limit_bytes=64 << 20,
        ),
        cost_estimate=cost,
    )(last_hidden_state, weight, bias)


# TODO(synk): the `self.llm(input_ids, output_hidden_states=True)` transformer
# forward and the freeze_layers(30) logic are external-model / training-setup
# concerns with no Pallas equivalent here; the kernel consumes the backbone's
# final hidden states directly.


if __name__ == "__main__":
    key = jax.random.PRNGKey(0)
    k_h, k_w, k_b = jax.random.split(key, 3)

    B, S = 2, 8  # small batch / seq; hidden is fixed at 4096 by the module
    last_hidden_state = jax.random.normal(k_h, (B, S, HIDDEN), dtype=jnp.float32)

    # Deterministic nn.Linear(4096, 1)-style init: U(-1/sqrt(H), 1/sqrt(H))
    bound = 1.0 / (HIDDEN ** 0.5)
    weight = jax.random.uniform(k_w, (HIDDEN, 1), jnp.float32, -bound, bound)
    bias = jax.random.uniform(k_b, (1,), jnp.float32, -bound, bound)

    score = reward_model_head(last_hidden_state, weight, bias)
    score = jax.block_until_ready(score)

    # Reference check in plain JAX (same semantics as the PyTorch forward).
    ref = jax.nn.sigmoid(last_hidden_state.mean(axis=1) @ weight + bias)
    assert score.shape == (B, 1)
    assert jnp.allclose(score, ref, atol=1e-5, rtol=1e-5)

    print("KERNEL_OK")
</pallas_src>

<mosaic_0001>
module attributes {stable_mosaic.version = 11 : i64} {
  func.func @_reward_head_kernel(%arg0: i32, %arg1: i32, %arg2: memref<2x8x4096xf32, #tpu.memory_space<vmem>>, %arg3: memref<4096x1xf32, #tpu.memory_space<vmem>>, %arg4: memref<1xf32, #tpu.memory_space<smem>>, %arg5: memref<2x1xf32, #tpu.memory_space<vmem>>, %arg6: memref<2x4096xf32, #tpu.memory_space<vmem>>) attributes {dimension_semantics = [#tpu.dimension_semantics<parallel>, #tpu.dimension_semantics<arbitrary>], iteration_bounds = array<i64: 1, 1>, scalar_prefetch = 0 : i64, scratch_operands = 1 : i64, tpu.core_type = #tpu.core_type<tc>, window_params = [{transform_indices = @transform_0, window_bounds = array<i64: 2, 8, 4096>}, {pipeline_mode = #tpu.pipeline_mode<synchronous>, transform_indices = @transform_1, window_bounds = array<i64: 4096, 1>}, {transform_indices = @transform_2, window_bounds = array<i64: 1>}, {transform_indices = @transform_3, window_bounds = array<i64: 2, 1>}]} {
    %c0_i32 = arith.constant 0 : i32
    %0 = arith.cmpi eq, %arg1, %c0_i32 : i32
    %1 = arith.extui %0 : i1 to i32
    %c0_i32_0 = arith.constant 0 : i32
    %2 = arith.cmpi ne, %1, %c0_i32_0 : i32
    scf.if %2 {
      %cst_9 = arith.constant 0.000000e+00 : f32
      %11 = vector.broadcast %cst_9 : f32 to vector<2x4096xf32>
      %c0_10 = arith.constant 0 : index
      %c0_11 = arith.constant 0 : index
      %12 = vector.load %arg6[%c0_10, %c0_11] : memref<2x4096xf32, #tpu.memory_space<vmem>>, vector<2x4096xf32>
      tpu.vector_store %arg6[%c0_10, %c0_11], %11 {strides = array<i32>} : memref<2x4096xf32, #tpu.memory_space<vmem>>, vector<2x4096xf32>,
    } else {
    }
    %c0 = arith.constant 0 : index
    %c0_1 = arith.constant 0 : index
    %c0_2 = arith.constant 0 : index
    %3 = vector.load %arg2[%c0, %c0_1, %c0_2] : memref<2x8x4096xf32, #tpu.memory_space<vmem>>, vector<2x8x4096xf32>
    %c0_3 = arith.constant 0 : index
    %c0_4 = arith.constant 0 : index
    %4 = vector.load %arg6[%c0_3, %c0_4] : memref<2x4096xf32, #tpu.memory_space<vmem>>, vector<2x4096xf32>
    %cst = arith.constant dense<0.000000e+00> : vector<2x4096xf32>
    %5 = vector.multi_reduction <add>, %3, %cst [1] : vector<2x8x4096xf32> to vector<2x4096xf32>
    %6 = arith.addf %4, %5 : vector<2x4096xf32>
    %c0_5 = arith.constant 0 : index
    %c0_6 = arith.constant 0 : index
    %7 = vector.load %arg6[%c0_5, %c0_6] : memref<2x4096xf32, #tpu.memory_space<vmem>>, vector<2x4096xf32>
    tpu.vector_store %arg6[%c0_5, %c0_6], %6 {strides = array<i32>} : memref<2x4096xf32, #tpu.memory_space<vmem>>, vector<2x4096xf32>,
    %c0_i32_7 = arith.constant 0 : i32
    %8 = arith.cmpi eq, %arg1, %c0_i32_7 : i32
    %9 = arith.extui %8 : i1 to i32
    %c0_i32_8 = arith.constant 0 : i32
    %10 = arith.cmpi ne, %9, %c0_i32_8 : i32
    scf.if %10 {
      %c0_9 = arith.constant 0 : index
      %c0_10 = arith.constant 0 : index
      %11 = vector.load %arg6[%c0_9, %c0_10] : memref<2x4096xf32, #tpu.memory_space<vmem>>, vector<2x4096xf32>
      %c0_11 = arith.constant 0 : index
      %c0_12 = arith.constant 0 : index
      %12 = vector.load %arg3[%c0_11, %c0_12] : memref<4096x1xf32, #tpu.memory_space<vmem>>, vector<4096x1xf32>
      %cst_13 = arith.constant dense<0.000000e+00> : vector<2x1xf32>
      %13 = tpu.matmul %11, %12, %cst_13 {dimension_numbers = #tpu.dot_dimension_numbers<[1], [0], [0], [1], [0, 0, 1, 1], [], []>} : vector<2x4096xf32>, vector<4096x1xf32>, vector<2x1xf32> -> vector<2x1xf32>
      %cst_14 = arith.constant 1.250000e-01 : f32
      %14 = vector.broadcast %cst_14 : f32 to vector<2x1xf32>
      %15 = arith.mulf %13, %14 : vector<2x1xf32>
      %c0_15 = arith.constant 0 : index
      %16 = memref.load %arg4[%c0_15] : memref<1xf32, #tpu.memory_space<smem>>
      %17 = vector.broadcast %16 : f32 to vector<2x1xf32>
      %18 = arith.addf %15, %17 : vector<2x1xf32>
      %19 = arith.negf %18 : vector<2x1xf32>
      %20 = math.exp %19 : vector<2x1xf32>
      %cst_16 = arith.constant 1.000000e+00 : f32
      %21 = vector.broadcast %cst_16 : f32 to vector<2x1xf32>
      %22 = arith.addf %21, %20 : vector<2x1xf32>
      %23 = arith.divf %21, %22 : vector<2x1xf32>
      %c0_17 = arith.constant 0 : index
      %c0_18 = arith.constant 0 : index
      %24 = vector.load %arg5[%c0_17, %c0_18] : memref<2x1xf32, #tpu.memory_space<vmem>>, vector<2x1xf32>
      tpu.vector_store %arg5[%c0_17, %c0_18], %23 {strides = array<i32>} : memref<2x1xf32, #tpu.memory_space<vmem>>, vector<2x1xf32>,
    } else {
    }
    return
  }
  func.func @transform_0(%arg0: i32, %arg1: i32) -> (i32, i32, i32) {
    %c0_i32 = arith.constant 0 : i32
    %c0_i32_0 = arith.constant 0 : i32
    return %arg0, %arg1, %c0_i32 : i32, i32, i32
  }
  func.func @transform_1(%arg0: i32, %arg1: i32) -> (i32, i32) {
    %c0_i32 = arith.constant 0 : i32
    %c0_i32_0 = arith.constant 0 : i32
    %c0_i32_1 = arith.constant 0 : i32
    return %c0_i32, %c0_i32_0 : i32, i32
  }
  func.func @transform_2(%arg0: i32, %arg1: i32) -> i32 {
    %c0_i32 = arith.constant 0 : i32
    %c0_i32_0 = arith.constant 0 : i32
    return %c0_i32 : i32
  }
  func.func @transform_3(%arg0: i32, %arg1: i32) -> (i32, i32) {
    %c0_i32 = arith.constant 0 : i32
    %c0_i32_0 = arith.constant 0 : i32
    return %arg0, %c0_i32 : i32, i32
  }
}

</mosaic_0001>

<bundles_post_ra>
// kernel: tpu_custom_call.1
= control target key start
LH: loop header
LB: loop body
LE: loop exit
PB: predicated region body
PF: predicated region fallthrough
CT: control target
= control target key end

     0   :  { %9 = vsyncpa [#allocation5], 0  ;;  %s5106_s0 = inlined_call_operand.hbm [shape: f32[2,8,4096], index: 0, kind: input, shape index: {}]   ;;  %s5107_s1 = inlined_call_operand.hbm [shape: f32[4096,1], index: 1, kind: input, shape index: {}]   ;;  %s5108_s2 = inlined_call_operand.<no memory space> [shape: f32[1], index: 2, kind: input, shape index: {}]   ;;  %s5109_s3 = inlined_call_operand.hbm [shape: f32[2,1], index: 3, kind: output, shape index: {}]  }
   0x1   :  { %10 = vsyncpa [#allocation8], 0 }
   0x2   :  { %11 = vsyncpa [#allocation6], 0  ;;  %s3938_s12 = smov [#allocation4]   ;;  %s3866_s16 = scalar_lea.hbm %s5106_s0, 8192 }
   0x3   :  { %s17_s13 = sshll.u32 %s3938_s12, 4  ;;  %p3867_p0 = scmp.ne.s32.totalorder %s5106_s0, %s3866_s16  ;;  %s18_s13 = int_to_ptr.vmem [resolvable:$true] %s17_s13 }
   0x4   :  { %p3870_p1 = scmp.lt.u32.totalorder %s3866_s16, %s5106_s0 }
   0x6   :  { %p3872_p2 = pnand %p3870_p1, %p3867_p0 }
   0x8   :  { %3875 = shalt.err (!%p3872_p2)
}
   0x9   :  { %s3876_s21 = scalar_lea.vmem %s18_s13, 8192  ;;  %p3881_p4 = scmp.lt.s32.totalorder %s18_s13, %s18_s13 }
   0xa   :  { %p3877_p3 = scmp.ne.s32.totalorder %s18_s13, %s3876_s21  ;;  %p3882_p5 = scmp.lt.s32.totalorder %s3876_s21, %s3876_s21 }
   0xc   :  { %p3883_p6 = por %p3882_p5, %p3881_p4 }
   0xe   :  { %p3884_p7 = pnand %p3883_p6, %p3877_p3 }
  0x10   :  { %3887 = shalt.err (!%p3884_p7)
}
  0x11   :  { %s3939_s22 = smov 4096   ;;  %s3940_s23 = smov 256  }
  0x12   :  { %23 = dma.hbm_to_vmem [thread:$0]  %s5106_s0, 8192, %s18_s13, [#allocation5], %s3939_s22, %s3939_s22, %s3940_s23  }
  0x13   :  { %s3941_s26 = smov [#allocation7]   ;;  %s3888_s30 = scalar_lea.hbm %s5107_s1, 65536 }
  0x14   :  { %s29_s27 = sshll.u32 %s3941_s26, 4  ;;  %p3889_p8 = scmp.ne.s32.totalorder %s5107_s1, %s3888_s30  ;;  %s30_s27 = int_to_ptr.vmem [resolvable:$true] %s29_s27 }
  0x15   :  { %p3892_p9 = scmp.lt.u32.totalorder %s3888_s30, %s5107_s1 }
  0x17   :  { %p3894_p10 = pnand %p3892_p9, %p3889_p8 }
  0x19   :  { %3897 = shalt.err (!%p3894_p10)
}
  0x1a   :  { %s3898_s8 = scalar_lea.vmem %s30_s27, 65536  ;;  %p3903_p12 = scmp.lt.s32.totalorder %s30_s27, %s30_s27 }
  0x1b   :  { %p3899_p11 = scmp.ne.s32.totalorder %s30_s27, %s3898_s8  ;;  %p3904_p13 = scmp.lt.s32.totalorder %s3898_s8, %s3898_s8 }
  0x1d   :  { %p3905_p0 = por %p3904_p13, %p3903_p12 }
  0x1f   :  { %p3906_p1 = pnand %p3905_p0, %p3899_p11 }
  0x21   :  { %3909 = shalt.err (!%p3906_p1)
}
  0x22   :  { %s3942_s0 = smov 128   ;;  %s3943_s9 = smov 8  }
  0x23   :  { %35 = dma.hbm_to_vmem [thread:$0]  %s5107_s1, 65536, %s30_s27, [#allocation8], %s3942_s0, %s3942_s0, %s3943_s9  }
  0x24   :  { %3932 = dma.done.wait [#allocation5], 8192  }
  0x25   :  { %3933 = vsyncadd [#allocation5], 4294959104 }
  0x26   :  { %3934 = dma.done.wait [#allocation8], 65536  }
  0x27   :  { %3935 = vsyncadd [#allocation8], 4294901760  ;;  %v961_v0 = vld [vmem:[#allocation7 + $0x80] sm:$0xff]  ;;  %v962_v1 = vld [vmem:[#allocation7 + $0x88] sm:$0xff]  ;;  %v3944_v50 = vmov 1983009808   ;;  %v581_v52 = vlaneseq }
  0x28   :  { %v993_v2 = vld [vmem:[#allocation7 + $0x180] sm:$0xff]  ;;  %v3342_v3 = vpack.c.bf16 %v962_v1, %v961_v0  ;;  %v994_v4 = vld [vmem:[#allocation7 + $0x188] sm:$0xff]  ;;  %v963_v11 = vld [vmem:[#allocation7 + $0x90] sm:$0xff]  ;;  %v579_v51 = vunpack.c.l.s4 %v3944_v50  ;;  %vm853_vm0 = vcmask 1041409   ;;  %vm855_vm1 = vcmask 1043459   ;;  %s3945_s13 = smov [#allocation9]  }
  0x29   :  { %v945_v5 = vld [vmem:[#allocation7] sm:$0xff]  ;;  %v946_v6 = vld [vmem:[#allocation7 + $0x8] sm:$0xff]  ;;  %v3374_v7 = vpack.c.bf16 %v994_v4, %v993_v2  ;;  %v964_v13 = vld [vmem:[#allocation7 + $0x98] sm:$0xff]  ;;  %vm857_vm2 = vcmask 1045509   ;;  %vm859_vm3 = vcmask 1047559   ;;  %s2771_s14 = sshll.u32 %s3945_s13, 4  ;;  %s2772_s14 = int_to_ptr.vmem [resolvable:$true] %s2771_s14 }
  0x2a   :  { %v3344_v8 = vpack.c.bf16 %v946_v6, %v945_v5  ;;  %v977_v9 = vld [vmem:[#allocation7 + $0x100] sm:$0xff]  ;;  %v978_v10 = vld [vmem:[#allocation7 + $0x108] sm:$0xff]  ;;  %3343 = vmatprep.subr.bf16.mxu0 %v3342_v3  ;;  %v995_v14 = vld [vmem:[#allocation7 + $0x190] sm:$0xff]  ;;  %v3346_v16 = vpack.c.bf16 %v964_v13, %v963_v11  ;;  %v580_v5 = vunpack.c.0.s8 %v579_v51  ;;  %v582_v6 = vshrl.u32 %v581_v52, 7  ;;  %s3910_s15 = scalar_lea.vmem %s2772_s14, 32  ;;  %p3915_p3 = scmp.lt.s32.totalorder %s2772_s14, %s2772_s14 }
  0x2b   :  { %v3376_v12 = vpack.c.bf16 %v978_v10, %v977_v9  ;;  %v996_v15 = vld [vmem:[#allocation7 + $0x198] sm:$0xff]  ;;  %3375 = vmatprep.subr.bf16.mxu1 %v3374_v7  ;;  %v947_v18 = vld [vmem:[#allocation7 + $0x10] sm:$0xff]  ;;  %v965_v23 = vld [vmem:[#allocation7 + $0xa0] sm:$0xff]  ;;  %vm2763_vm4 = vcmask 1024   ;;  %p3911_p2 = scmp.ne.s32.totalorder %s2772_s14, %s3910_s15  ;;  %p3916_p4 = scmp.lt.s32.totalorder %s3910_s15, %s3910_s15 }
  0x2c   :  { %3345 = vmatpush3.bf16.msra.mxu0 %v3344_v8  ;;  %v3378_v17 = vpack.c.bf16 %v996_v15, %v995_v14  ;;  %v948_v19 = vld [vmem:[#allocation7 + $0x18] sm:$0xff]  ;;  %v979_v20 = vld [vmem:[#allocation7 + $0x110] sm:$0xff]  ;;  %v966_v24 = vld [vmem:[#allocation7 + $0xa8] sm:$0xff] }
  0x2d   :  { %3377 = vmatpush3.bf16.msra.mxu1 %v3376_v12  ;;  %v3348_v21 = vpack.c.bf16 %v948_v19, %v947_v18  ;;  %v980_v22 = vld [vmem:[#allocation7 + $0x118] sm:$0xff]  ;;  %3347 = vmatprep.subr.bf16.mxu0 %v3346_v16  ;;  %v3350_v26 = vpack.c.bf16 %v966_v24, %v965_v23  ;;  %v997_v27 = vld [vmem:[#allocation7 + $0x1a0] sm:$0xff]  ;;  %v998_v28 = vld [vmem:[#allocation7 + $0x1a8] sm:$0xff]  ;;  %v3996_v23 = vsub.s32 %v580_v5, %v582_v6  ;;  %p3917_p5 = por %p3916_p4, %p3915_p3 }
  0x2e   :  { %3379 = vmatprep.subr.bf16.mxu1 %v3378_v17  ;;  %v3380_v25 = vpack.c.bf16 %v980_v22, %v979_v20  ;;  %v949_v29 = vld [vmem:[#allocation7 + $0x20] sm:$0xff]  ;;  %v3382_v30 = vpack.c.bf16 %v998_v28, %v997_v27  ;;  %v950_v31 = vld [vmem:[#allocation7 + $0x28] sm:$0xff]  ;;  %v967_v35 = vld [vmem:[#allocation7 + $0xb0] sm:$0xff] }
  0x2f   :  { %v981_v32 = vld [vmem:[#allocation7 + $0x120] sm:$0xff]  ;;  %v982_v33 = vld [vmem:[#allocation7 + $0x128] sm:$0xff]  ;;  %v3352_v34 = vpack.c.bf16 %v950_v31, %v949_v29  ;;  %v968_v36 = vld [vmem:[#allocation7 + $0xb8] sm:$0xff]  ;;  %p3918_p6 = pnand %p3917_p5, %p3911_p2 }
  0x30   :  { %3349 = vmatpush3.bf16.msra.mxu0 %v3348_v21  ;;  %v999_v37 = vld [vmem:[#allocation7 + $0x1b0] sm:$0xff]  ;;  %v3384_v38 = vpack.c.bf16 %v982_v33, %v981_v32  ;;  %v3354_v39 = vpack.c.bf16 %v968_v36, %v967_v35  ;;  %v1000_v40 = vld [vmem:[#allocation7 + $0x1b8] sm:$0xff]  ;;  %v969_v46 = vld [vmem:[#allocation7 + $0xc0] sm:$0xff] }
  0x31   :  { %3381 = vmatpush3.bf16.msra.mxu1 %v3380_v25  ;;  %3351 = vmatprep.subr.bf16.mxu0 %v3350_v26  ;;  %v951_v41 = vld [vmem:[#allocation7 + $0x30] sm:$0xff]  ;;  %v952_v42 = vld [vmem:[#allocation7 + $0x38] sm:$0xff]  ;;  %v3386_v43 = vpack.c.bf16 %v1000_v40, %v999_v37  ;;  %v970_v47 = vld [vmem:[#allocation7 + $0xc8] sm:$0xff] }
  0x32   :  { %3383 = vmatprep.subr.bf16.mxu1 %v3382_v30  ;;  %v983_v44 = vld [vmem:[#allocation7 + $0x130] sm:$0xff]  ;;  %v984_v45 = vld [vmem:[#allocation7 + $0x138] sm:$0xff]  ;;  %v1001_v48 = vld [vmem:[#allocation7 + $0x1c0] sm:$0xff]  ;;  %v3356_v53 = vpack.c.bf16 %v952_v42, %v951_v41  ;;  %v3358_v57 = vpack.c.bf16 %v970_v47, %v969_v46 }
  0x33   :  { %v1002_v49 = vld [vmem:[#allocation7 + $0x1c8] sm:$0xff]  ;;  %v953_v54 = vld [vmem:[#allocation7 + $0x40] sm:$0xff]  ;;  %v3388_v56 = vpack.c.bf16 %v984_v45, %v983_v44  ;;  %v971_v60 = vld [vmem:[#allocation7 + $0xd0] sm:$0xff] }
  0x34   :  { %3353 = vmatpush3.bf16.msra.mxu0 %v3352_v34  ;;  %v954_v55 = vld [vmem:[#allocation7 + $0x48] sm:$0xff]  ;;  %v985_v58 = vld [vmem:[#allocation7 + $0x140] sm:$0xff]  ;;  %v3390_v61 = vpack.c.bf16 %v1002_v49, %v1001_v48  ;;  %v972_v62 = vld [vmem:[#allocation7 + $0xd8] sm:$0xff] }
  0x35   :  { %3385 = vmatpush3.bf16.msra.mxu1 %v3384_v38  ;;  %3355 = vmatprep.subr.bf16.mxu0 %v3354_v39  ;;  %v986_v59 = vld [vmem:[#allocation7 + $0x148] sm:$0xff]  ;;  %v1003_v63 = vld [vmem:[#allocation7 + $0x1d0] sm:$0xff]  ;;  %v1004_v0 = vld [vmem:[#allocation7 + $0x1d8] sm:$0xff]  ;;  %v3360_v7 = vpack.c.bf16 %v954_v55, %v953_v54  ;;  %v3362_v12 = vpack.c.bf16 %v972_v62, %v971_v60 }
  0x36   :  { %3387 = vmatprep.subr.bf16.mxu1 %v3386_v43  ;;  %v955_v1 = vld [vmem:[#allocation7 + $0x50] sm:$0xff]  ;;  %v956_v2 = vld [vmem:[#allocation7 + $0x58] sm:$0xff]  ;;  %v973_v8 = vld [vmem:[#allocation7 + $0xe0] sm:$0xff]  ;;  %v3392_v11 = vpack.c.bf16 %v986_v59, %v985_v58  ;;  %v3394_v16 = vpack.c.bf16 %v1004_v0, %v1003_v63 }
  0x37   :  { %v987_v3 = vld [vmem:[#allocation7 + $0x150] sm:$0xff]  ;;  %v988_v4 = vld [vmem:[#allocation7 + $0x158] sm:$0xff]  ;;  %v974_v9 = vld [vmem:[#allocation7 + $0xe8] sm:$0xff]  ;;  %v3364_v24 = vpack.c.bf16 %v956_v2, %v955_v1 }
  0x38   :  { %3357 = vmatpush3.bf16.msra.mxu0 %v3356_v53  ;;  %v1005_v10 = vld [vmem:[#allocation7 + $0x1e0] sm:$0xff]  ;;  %v1006_v13 = vld [vmem:[#allocation7 + $0x1e8] sm:$0xff]  ;;  %v975_v19 = vld [vmem:[#allocation7 + $0xf0] sm:$0xff]  ;;  %v3396_v25 = vpack.c.bf16 %v988_v4, %v987_v3  ;;  %v3366_v26 = vpack.c.bf16 %v974_v9, %v973_v8 }
  0x39   :  { %3389 = vmatpush3.bf16.msra.mxu1 %v3388_v56  ;;  %3359 = vmatprep.subr.bf16.mxu0 %v3358_v57  ;;  %v957_v14 = vld [vmem:[#allocation7 + $0x60] sm:$0xff]  ;;  %v958_v15 = vld [vmem:[#allocation7 + $0x68] sm:$0xff]  ;;  %v976_v20 = vld [vmem:[#allocation7 + $0xf8] sm:$0xff]  ;;  %v3398_v27 = vpack.c.bf16 %v1006_v13, %v1005_v10 }
  0x3a   :  { %3391 = vmatprep.subr.bf16.mxu1 %v3390_v61  ;;  %v3990_v17 = vld [vmem:[#allocation7 + $0x160] sm:$0xff]  ;;  %v990_v18 = vld [vmem:[#allocation7 + $0x168] sm:$0xff]  ;;  %v3992_v21 = vld [vmem:[#allocation7 + $0x1f0] sm:$0xff]  ;;  %v3368_v31 = vpack.c.bf16 %v958_v15, %v957_v14  ;;  %v3370_v33 = vpack.c.bf16 %v976_v20, %v975_v19 }
  0x3b   :  { %v3994_v22 = vld [vmem:[#allocation7 + $0x1f8] sm:$0xff]  ;;  %v3998_v28 = vld [vmem:[#allocation7 + $0x70] sm:$0xff]  ;;  %v3400_v32 = vpack.c.bf16 %v990_v18, %v3990_v17  ;;  %v56_v35 = vld [vmem:[#allocation4] sm:$0xff] }
  0x3c   :  { %3361 = vmatpush3.bf16.msra.mxu0 %v3360_v7  ;;  %v4000_v29 = vld [vmem:[#allocation7 + $0x78] sm:$0xff]  ;;  %v4002_v30 = vld [vmem:[#allocation7 + $0x170] sm:$0xff]  ;;  %v57_v36 = vld [vmem:[#allocation4 + $0x8] sm:$0xff]  ;;  %v3402_v37 = vpack.c.bf16 %v3994_v22, %v3992_v21  ;;  %v128_v42 = vrot.slane %v56_v35, 4 }
  0x3d   :  { %3393 = vmatpush3.bf16.msra.mxu1 %v3392_v11  ;;  %3363 = vmatprep.subr.bf16.mxu0 %v3362_v12  ;;  %v4005_v34 = vld [vmem:[#allocation7 + $0x178] sm:$0xff]  ;;  %v3372_v38 = vpack.c.bf16 %v4000_v29, %v3998_v28  ;;  %v58_v39 = vld [vmem:[#allocation4 + $0x10] sm:$0xff]  ;;  %v88_v41 = vld [vmem:[#allocation4 + $0x100] sm:$0xff]  ;;  %v134_v43 = vrot.slane %v57_v36, 4 }
  0x3e   :  { %3395 = vmatprep.subr.bf16.mxu1 %v3394_v16  ;;  %v59_v40 = vld [vmem:[#allocation4 + $0x18] sm:$0xff]  ;;  %v3404_v44 = vpack.c.bf16 %v4005_v34, %v4002_v30  ;;  %v89_v45 = vld [vmem:[#allocation4 + $0x108] sm:$0xff]  ;;  %v90_v46 = vld [vmem:[#allocation4 + $0x110] sm:$0xff]  ;;  %v140_v48 = vrot.slane %v58_v39, 4  ;;  %v320_v50 = vrot.slane %v88_v41, 4  ;;  %v129_v51 = vadd.f32 %v128_v42, %v56_v35 }
  0x3f   :  { %v91_v47 = vld [vmem:[#allocation4 + $0x118] sm:$0xff]  ;;  %v146_v49 = vrot.slane %v59_v40, 4  ;;  %v135_v52 = vadd.f32 %v134_v43, %v57_v36  ;;  %v326_v53 = vrot.slane %v89_v45, 4  ;;  %v332_v54 = vrot.slane %v90_v46, 4  ;;  %v1025_v19 = vld [vmem:[#allocation7 + $0x280] sm:$0xff]  ;;  %v1026_v20 = vld [vmem:[#allocation7 + $0x288] sm:$0xff] }
  0x40   :  { %3365 = vmatpush3.bf16.msra.mxu0 %v3364_v24  ;;  %v141_v55 = vadd.f32 %v140_v48, %v58_v39  ;;  %v321_v57 = vadd.f32 %v320_v50, %v88_v41  ;;  %v338_v58 = vrot.slane %v91_v47, 4  ;;  %v130_v59 = vrot.slane %v129_v51, 2  ;;  %v4023_v50 = vld [vmem:[#allocation7 + $0x308] sm:$0xff] }
  0x41   :  { %3397 = vmatpush3.bf16.msra.mxu1 %v3396_v25  ;;  %3367 = vmatprep.subr.bf16.mxu0 %v3366_v26  ;;  %v147_v56 = vadd.f32 %v146_v49, %v59_v40  ;;  %v136_v60 = vrot.slane %v135_v52, 2  ;;  %v327_v61 = vadd.f32 %v326_v53, %v89_v45  ;;  %v333_v62 = vadd.f32 %v332_v54, %v90_v46  ;;  %v1057_v26 = vld [vmem:[#allocation7 + $0x380] sm:$0xff]  ;;  %v4019_v46 = vld [vmem:[#allocation7 + $0x208] sm:$0xff]  ;;  %v4029_v53 = vld [vmem:[#allocation7 + $0x210] sm:$0xff] }
  0x42   :  { %3399 = vmatprep.subr.bf16.mxu1 %v3398_v27  ;;  %v142_v63 = vrot.slane %v141_v55, 2  ;;  %v322_v1 = vrot.slane %v321_v57, 2  ;;  %v339_v2 = vadd.f32 %v338_v58, %v91_v47  ;;  %v131_v3 = vadd.f32 %v130_v59, %v129_v51  ;;  %v1058_v27 = vld [vmem:[#allocation7 + $0x388] sm:$0xff]  ;;  %v4017_v45 = vld [vmem:[#allocation7 + $0x200] sm:$0xff]  ;;  %v4025_v51 = vld [vmem:[#allocation7 + $0x290] sm:$0xff] }
  0x43   :  { %v148_v0 = vrot.slane %v147_v56, 2  ;;  %v137_v4 = vadd.f32 %v136_v60, %v135_v52  ;;  %v328_v5 = vrot.slane %v327_v61, 2  ;;  %v334_v6 = vrot.slane %v333_v62, 2  ;;  %v4021_v49 = vld [vmem:[#allocation7 + $0x300] sm:$0xff]  ;;  %v4027_v52 = vld [vmem:[#allocation7 + $0x298] sm:$0xff] }
  0x44   :  { %3369 = vmatpush3.bf16.msra.mxu0 %v3368_v31  ;;  %v143_v7 = vadd.f32 %v142_v63, %v141_v55  ;;  %v323_v9 = vadd.f32 %v322_v1, %v321_v57  ;;  %v340_v10 = vrot.slane %v339_v2, 2  ;;  %v132_v11 = vrot.slane %v131_v3, 1  ;;  %v4031_v54 = vld [vmem:[#allocation7 + $0x218] sm:$0xff]  ;;  %v60_v63 = vld [vmem:[#allocation4 + $0x20] sm:$0xff] }
  0x45   :  { %3401 = vmatpush3.bf16.msra.mxu1 %v3400_v32  ;;  %3371 = vmatprep.subr.bf16.mxu0 %v3370_v33  ;;  %v149_v8 = vadd.f32 %v148_v0, %v147_v56  ;;  %v138_v12 = vrot.slane %v137_v4, 1  ;;  %v329_v13 = vadd.f32 %v328_v5, %v327_v61  ;;  %v335_v14 = vadd.f32 %v334_v6, %v333_v62  ;;  %v4033_v56 = vld [vmem:[#allocation7 + $0x390] sm:$0xff]  ;;  %v4035_v57 = vld [vmem:[#allocation7 + $0x398] sm:$0xff]  ;;  %v61_v0 = vld [vmem:[#allocation4 + $0x28] sm:$0xff] }
  0x46   :  { %3403 = vmatprep.subr.bf16.mxu1 %v3402_v37  ;;  %v144_v15 = vrot.slane %v143_v7, 1  ;;  %v324_v17 = vrot.slane %v323_v9, 1  ;;  %v341_v18 = vadd.f32 %v340_v10, %v339_v2  ;;  %v133_v21 = vadd.f32 %v132_v11, %v131_v3  ;;  %v62_v3 = vld [vmem:[#allocation4 + $0x30] sm:$0xff]  ;;  %v92_v5 = vld [vmem:[#allocation4 + $0x120] sm:$0xff] }
  0x47   :  { %v150_v16 = vrot.slane %v149_v8, 1  ;;  %v139_v22 = vadd.f32 %v138_v12, %v137_v4  ;;  %v330_v24 = vrot.slane %v329_v13, 1  ;;  %v336_v25 = vrot.slane %v335_v14, 1  ;;  %v63_v4 = vld [vmem:[#allocation4 + $0x38] sm:$0xff] }
  0x48   :  { %3373 = vmatpush3.bf16.msra.mxu0 %v3372_v38  ;;  %v145_v28 = vadd.f32 %v144_v15, %v143_v7  ;;  %v325_v30 = vadd.f32 %v324_v17, %v323_v9  ;;  %v342_v31 = vrot.slane %v341_v18, 1  ;;  %v3406_v35 = vpack.c.bf16 %v1026_v20, %v1025_v19  ;;  %v93_v9 = vld [vmem:[#allocation4 + $0x128] sm:$0xff] }
  0x49   :  { %3405 = vmatpush3.bf16.msra.mxu1 %v3404_v44  ;;  %v151_v29 = vadd.f32 %v150_v16, %v149_v8  ;;  %v331_v32 = vadd.f32 %v330_v24, %v329_v13  ;;  %v337_v33 = vadd.f32 %v336_v25, %v335_v14  ;;  %v576_v34 = vcombine.low %v133_v21, %v139_v22  ;;  %v94_v21 = vld [vmem:[#allocation4 + $0x130] sm:$0xff] }
  0x4a   :  { %v343_v36 = vadd.f32 %v342_v31, %v341_v18  ;;  %v3438_v39 = vpack.c.bf16 %v1058_v27, %v1057_v26  ;;  %3407 = vmatprep.subr.bf16.mxu0 %v3406_v35  ;;  %v3408_v58 = vpack.c.bf16 %v4019_v46, %v4017_v45  ;;  %v3440_v60 = vpack.c.bf16 %v4023_v50, %v4021_v49  ;;  %v4053_v31 = vld [vmem:[#allocation7 + $0x310] sm:$0xff]  ;;  %v4059_v45 = vld [vmem:[#allocation7 + $0x228] sm:$0xff]  ;;  %v1061_v46 = vld [vmem:[#allocation7 + $0x3a0] sm:$0xff] }
  0x4b   :  { %v577_v37 = vcombine.low %v145_v28, %v151_v29  ;;  %v712_v40 = vcombine.low %v325_v30, %v331_v32  ;;  %v584_v38 = vrot.slane %v576_v34, %v3996_v23  ;;  %v3410_v61 = vpack.c.bf16 %v4027_v52, %v4025_v51  ;;  %v4055_v32 = vld [vmem:[#allocation7 + $0x318] sm:$0xff] }
  0x4c   :  { %v713_v42 = vcombine.low %v337_v33, %v343_v36  ;;  %3439 = vmatprep.subr.bf16.mxu1 %v3438_v39  ;;  %v3412_v62 = vpack.c.bf16 %v4031_v54, %v4029_v53  ;;  %v3442_v2 = vpack.c.bf16 %v4035_v57, %v4033_v56  ;;  %v152_v6 = vrot.slane %v60_v63, 4  ;;  %v95_v33 = vld [vmem:[#allocation4 + $0x138] sm:$0xff]  ;;  %v4088_v56 = vld [vmem:[#allocation7 + $0x2c0] sm:$0xff]  ;;  %v4090_v57 = vld [vmem:[#allocation7 + $0x2c8] sm:$0xff] }
  0x4d   :  { %v591_v41 = vrot.slane %v577_v37, %v3996_v23  ;;  %v720_v43 = vrot.slane %v712_v40, %v3996_v23  ;;  %v158_v7 = vrot.slane %v61_v0, 4  ;;  %v164_v10 = vrot.slane %v62_v3, 4  ;;  %v1029_v40 = vld [vmem:[#allocation7 + $0x2a0] sm:$0xff]  ;;  %v4102_v53 = vld [vmem:[#allocation7 + $0x248] sm:$0xff] }
  0x4e   :  { %v727_v44 = vrot.slane %v713_v42, %v3996_v23  ;;  %v170_v11 = vrot.slane %v63_v4, 4  ;;  %v344_v12 = vrot.slane %v92_v5, 4  ;;  %v153_v14 = vadd.f32 %v152_v6, %v60_v63  ;;  %v4104_v54 = vld [vmem:[#allocation7 + $0x3c0] sm:$0xff] }
  0x4f   :  { %v592_v47 = vcombine.low %v584_v38, %v591_v41  ;;  %v159_v15 = vadd.f32 %v158_v7, %v61_v0  ;;  %v350_v16 = vrot.slane %v93_v9, 4  ;;  %v165_v19 = vadd.f32 %v164_v10, %v62_v3  ;;  %v1030_v38 = vld [vmem:[#allocation7 + $0x2a8] sm:$0xff]  ;;  %v4057_v41 = vld [vmem:[#allocation7 + $0x220] sm:$0xff]  ;;  %v1031_v10 = vld [vmem:[#allocation7 + $0x2b0] sm:$0xff] }
  0x50   :  { %v728_v48 = vcombine.low %v720_v43, %v727_v44  ;;  %v171_v20 = vadd.f32 %v170_v11, %v63_v4  ;;  %v154_v22 = vrot.slane %v153_v14, 2  ;;  %v345_v25 = vadd.f32 %v344_v12, %v92_v5  ;;  %v4063_v5 = vld [vmem:[#allocation7 + $0x320] sm:$0xff]  ;;  %v1032_v11 = vld [vmem:[#allocation7 + $0x2b8] sm:$0xff] }
  0x51   :  { %v160_v24 = vrot.slane %v159_v15, 2  ;;  %v351_v26 = vadd.f32 %v350_v16, %v93_v9  ;;  %v166_v29 = vrot.slane %v165_v19, 2  ;;  %v356_v44 = vrot.slane %v94_v21, 4  ;;  %v1046_v9 = vld [vmem:[#allocation7 + $0x328] sm:$0xff] }
  0x52   :  { %v852_v55 = vrot.slane %v728_v48, 7  ;;  %v172_v30 = vrot.slane %v171_v20, 2  ;;  %v155_v34 = vadd.f32 %v154_v22, %v153_v14  ;;  %v346_v36 = vrot.slane %v345_v25, 2  ;;  %v4075_v14 = vld [vmem:[#allocation7 + $0x238] sm:$0xff]  ;;  %v4096_v22 = vld [vmem:[#allocation7 + $0x330] sm:$0xff] }
  0x53   :  { %v161_v35 = vadd.f32 %v160_v24, %v159_v15  ;;  %v352_v37 = vrot.slane %v351_v26, 2  ;;  %v167_v42 = vadd.f32 %v166_v29, %v165_v19  ;;  %v357_v0 = vadd.f32 %v356_v44, %v94_v21  ;;  %v1063_v15 = vld [vmem:[#allocation7 + $0x3b0] sm:$0xff]  ;;  %v4098_v24 = vld [vmem:[#allocation7 + $0x338] sm:$0xff]  ;;  %v4137_v44 = vld [vmem:[#allocation7 + $0x2e8] sm:$0xff] }
  0x54   :  { %v854_v59 = vsel %vm853_vm0, %v852_v55, %v592_v47  ;;  %v173_v43 = vadd.f32 %v172_v30, %v171_v20  ;;  %v1062_v47 = vld [vmem:[#allocation7 + $0x3a8] sm:$0xff]  ;;  %v156_v48 = vrot.slane %v155_v34, 1  ;;  %v347_v52 = vadd.f32 %v346_v36, %v345_v25  ;;  %v4100_v25 = vld [vmem:[#allocation7 + $0x240] sm:$0xff]  ;;  %v4113_v29 = vld [vmem:[#allocation7 + $0x2d0] sm:$0xff] }
  0x55   :  { %v856_v1 = vsel %vm855_vm1, %v852_v55, %v854_v59  ;;  %v162_v51 = vrot.slane %v161_v35, 1  ;;  %v168_v59 = vrot.slane %v167_v42, 1  ;;  %v3444_v3 = vpack.c.bf16 %v4055_v32, %v4053_v31  ;;  %v4115_v30 = vld [vmem:[#allocation7 + $0x2d8] sm:$0xff]  ;;  %v4121_v36 = vld [vmem:[#allocation7 + $0x3d0] sm:$0xff] }
  0x56   :  { %v858_v8 = vsel %vm857_vm2, %v852_v55, %v856_v1  ;;  %v174_v63 = vrot.slane %v173_v43, 1  ;;  %v362_v1 = vrot.slane %v95_v33, 4  ;;  %v3414_v4 = vpack.c.bf16 %v1030_v38, %v1029_v40 }
  0x57   :  { %v860_v13 = vsel %vm859_vm3, %v852_v55, %v858_v8  ;;  %v353_v55 = vadd.f32 %v352_v37, %v351_v26  ;;  %v348_v6 = vrot.slane %v347_v52, 1  ;;  %v3446_v8 = vpack.c.bf16 %v1062_v47, %v1061_v46  ;;  %v4123_v37 = vld [vmem:[#allocation7 + $0x3d8] sm:$0xff] }
  0x58   :  { %v1472_v17 = vrot.slane %v860_v13, %v3996_v23  ;;  %v1465_v18 = vcombine.high %v860_v13, %v860_v13  ;;  %v363_v12 = vadd.f32 %v362_v1, %v95_v33  ;;  %v4073_v13 = vld [vmem:[#allocation7 + $0x230] sm:$0xff]  ;;  %v4077_v49 = vadd.f32 %v156_v48, %v155_v34 }
  0x59   :  { %v354_v7 = vrot.slane %v353_v55, 1  ;;  %v4079_v50 = vadd.f32 %v162_v51, %v161_v35  ;;  %v4083_v16 = vadd.f32 %v174_v63, %v173_v43  ;;  %v3418_v21 = vpack.c.bf16 %v1032_v11, %v1031_v10  ;;  %v4117_v34 = vld [vmem:[#allocation7 + $0x250] sm:$0xff]  ;;  %v4119_v35 = vld [vmem:[#allocation7 + $0x258] sm:$0xff]  ;;  %v4135_v43 = vld [vmem:[#allocation7 + $0x2e0] sm:$0xff] }
  0x5a   :  { %v1480_v27 = vcombine.high %v1472_v17, %v1472_v17  ;;  %v1479_v28 = vrot.slane %v1465_v18, %v3996_v23  ;;  %v364_v20 = vrot.slane %v363_v12, 2  ;;  %v3448_v26 = vpack.c.bf16 %v1046_v9, %v4063_v5  ;;  %v4161_v5 = vld [vmem:[#allocation7 + $0x2f0] sm:$0xff]  ;;  %v4171_v10 = vld [vmem:[#allocation7 + $0x278] sm:$0xff] }
  0x5b   :  { %v4094_v18 = vadd.f32 %v354_v7, %v353_v55  ;;  %v3420_v38 = vpack.c.bf16 %v4075_v14, %v4073_v13  ;;  %v3422_v51 = vpack.c.bf16 %v4090_v57, %v4088_v56  ;;  %v4147_v55 = vld [vmem:[#allocation7 + $0x3e0] sm:$0xff]  ;;  %v3452_v63 = vpack.c.bf16 %v4098_v24, %v4096_v22  ;;  %v4169_v9 = vld [vmem:[#allocation7 + $0x270] sm:$0xff] }
  0x5c   :  { %1697 = vmatprep.mubr.f32.mxu0 %v1480_v27  ;;  %v1481_v39 = vcombine.high %v1479_v28, %v1479_v28  ;;  %v4109_v27 = vld [vmem:[#allocation7 + $0x340] sm:$0xff]  ;;  %v365_v32 = vadd.f32 %v364_v20, %v363_v12  ;;  %v3428_v12 = vpack.c.bf16 %v4119_v35, %v4117_v34  ;;  %v3458_v13 = vpack.c.bf16 %v4123_v37, %v4121_v36  ;;  %v4179_v14 = vld [vmem:[#allocation7 + $0x3f0] sm:$0xff] }
  0x5d   :  { %1698 = vmatmul.mubr.f32.vlgmr.msra.gmra.mrb[0].mxu0 %v1472_v17  ;;  %v1064_v17 = vld [vmem:[#allocation7 + $0x3b8] sm:$0xff]  ;;  %v64_v20 = vld [vmem:[#allocation4 + $0x40] sm:$0xff] }
  0x5e   :  { %1767 = vmatprep.mubr.f32.mxu1 %v1481_v39  ;;  %3409 = vmatpush3.bf16.msra.mxu0 %v3408_v58  ;;  %v3416_v58 = vpack.c.bf16 %v4059_v45, %v4057_v41  ;;  %v3450_v33 = vpack.c.bf16 %v1064_v17, %v1063_v15  ;;  %v593_v39 = vcombine.low %v4077_v49, %v4079_v50  ;;  %v4131_v41 = vld [vmem:[#allocation7 + $0x350] sm:$0xff]  ;;  %v4139_v45 = vld [vmem:[#allocation7 + $0x260] sm:$0xff]  ;;  %v366_v47 = vrot.slane %v365_v32, 1  ;;  %v4181_v15 = vld [vmem:[#allocation7 + $0x3f8] sm:$0xff] }
  0x5f   :  { %1768 = vmatmul.mubr.f32.vlgmr.msra.gmra.mrb[0].mxu1 %v1479_v28  ;;  %3411 = vmatprep.subr.bf16.mxu0 %v3410_v61  ;;  %v358_v61 = vrot.slane %v357_v0, 2  ;;  %v4111_v28 = vld [vmem:[#allocation7 + $0x348] sm:$0xff]  ;;  %v3466_v22 = vpack.c.bf16 %v4181_v15, %v4179_v14  ;;  %v1075_v15 = vld [vmem:[#allocation7 + $0x410] sm:$0xff] }
  0x60   :  { %3441 = vmatpush3.bf16.msra.mxu1 %v3440_v60  ;;  %v4081_v60 = vadd.f32 %v168_v59, %v167_v42  ;;  %v4133_v42 = vld [vmem:[#allocation7 + $0x358] sm:$0xff]  ;;  %v4149_v59 = vld [vmem:[#allocation7 + $0x3e8] sm:$0xff]  ;;  %v3456_v7 = vpack.c.bf16 %v4111_v28, %v4109_v27  ;;  %v601_v11 = vrot.slane %v593_v39, %v3996_v23 }
  0x61   :  { %3443 = vmatprep.subr.bf16.mxu1 %v3442_v2  ;;  %v4092_v2 = vadd.f32 %v348_v6, %v347_v52  ;;  %v359_v19 = vadd.f32 %v358_v61, %v357_v0  ;;  %v4145_v52 = vld [vmem:[#allocation7 + $0x268] sm:$0xff]  ;;  %v3424_v0 = vpack.c.bf16 %v4102_v53, %v4100_v25  ;;  %v367_v6 = vadd.f32 %v366_v47, %v365_v32  ;;  %v66_v25 = vld [vmem:[#allocation4 + $0x50] sm:$0xff]  ;;  %v67_v53 = vld [vmem:[#allocation4 + $0x58] sm:$0xff] }
  0x62   :  { %3413 = vmatpush3.bf16.msra.mxu0 %v3412_v62  ;;  %v4106_v62 = vld [vmem:[#allocation7 + $0x3c8] sm:$0xff]  ;;  %v594_v40 = vcombine.low %v4081_v60, %v4083_v16  ;;  %v3460_v60 = vpack.c.bf16 %v4133_v42, %v4131_v41  ;;  %v3430_v16 = vpack.c.bf16 %v4137_v44, %v4135_v43  ;;  %v3432_v17 = vpack.c.bf16 %v4145_v52, %v4139_v45  ;;  %v4205_v47 = vld [vmem:[#allocation7 + $0x378] sm:$0xff]  ;;  %v4226_v45 = vld [vmem:[#allocation7 + $0x500] sm:$0xff] }
  0x63   :  { %3415 = vmatprep.subr.bf16.mxu0 %v3414_v4  ;;  %v360_v31 = vrot.slane %v359_v19, 1  ;;  %v729_v48 = vcombine.low %v4092_v2, %v4094_v18  ;;  %v3454_v1 = vpack.c.bf16 %v4106_v62, %v4104_v54  ;;  %v4159_v4 = vld [vmem:[#allocation7 + $0x368] sm:$0xff]  ;;  %v3462_v56 = vpack.c.bf16 %v4149_v59, %v4147_v55  ;;  %v96_v54 = vld [vmem:[#allocation4 + $0x140] sm:$0xff] }
  0x64   :  { %3445 = vmatpush3.bf16.msra.mxu1 %v3444_v3  ;;  %v4157_v3 = vld [vmem:[#allocation7 + $0x360] sm:$0xff]  ;;  %v608_v61 = vrot.slane %v594_v40, %v3996_v23  ;;  %v3436_v18 = vpack.c.bf16 %v4171_v10, %v4169_v9  ;;  %v176_v62 = vrot.slane %v64_v20, 4  ;;  %v97_v28 = vld [vmem:[#allocation4 + $0x148] sm:$0xff]  ;;  %v368_v32 = vrot.slane %v96_v54, 4 }
  0x65   :  { %3447 = vmatprep.subr.bf16.mxu1 %v3446_v8  ;;  %v361_v46 = vadd.f32 %v360_v31, %v359_v19  ;;  %v4167_v8 = vld [vmem:[#allocation7 + $0x2f8] sm:$0xff]  ;;  %v737_v50 = vrot.slane %v729_v48, %v3996_v23  ;;  %v3464_v57 = vpack.c.bf16 %v4159_v4, %v4157_v3  ;;  %v194_v31 = vrot.slane %v67_v53, 4 }
  0x66   :  { %3417 = vmatpush3.bf16.msra.mxu0 %v3416_v58  ;;  %v3426_v58 = vpack.c.bf16 %v4115_v30, %v4113_v29  ;;  %v3434_v2 = vpack.c.bf16 %v4167_v8, %v4161_v5  ;;  %v609_v24 = vcombine.low %v601_v11, %v608_v61  ;;  %v98_v29 = vld [vmem:[#allocation4 + $0x150] sm:$0xff]  ;;  %v188_v30 = vrot.slane %v66_v25, 4  ;;  %v1092_v8 = vld [vmem:[#allocation7 + $0x498] sm:$0xff] }
  0x67   :  { %3419 = vmatprep.subr.bf16.mxu0 %v3418_v21  ;;  %v730_v49 = vcombine.low %v361_v46, %v367_v6  ;;  %v65_v21 = vld [vmem:[#allocation4 + $0x48] sm:$0xff]  ;;  %v374_v35 = vrot.slane %v97_v28, 4  ;;  %v380_v36 = vrot.slane %v98_v29, 4  ;;  %v195_v40 = vadd.f32 %v194_v31, %v67_v53  ;;  %v4203_v46 = vld [vmem:[#allocation7 + $0x370] sm:$0xff]  ;;  %v4209_v6 = vld [vmem:[#allocation7 + $0x400] sm:$0xff] }
  0x68   :  { %3449 = vmatpush3.bf16.msra.mxu1 %v3448_v26  ;;  %v182_v26 = vrot.slane %v65_v21, 4  ;;  %v189_v39 = vadd.f32 %v188_v30, %v66_v25  ;;  %v1106_v30 = vld [vmem:[#allocation7 + $0x508] sm:$0xff]  ;;  %v1091_v5 = vld [vmem:[#allocation7 + $0x490] sm:$0xff] }
  0x69   :  { %3451 = vmatprep.subr.bf16.mxu1 %v3450_v33  ;;  %v744_v19 = vrot.slane %v730_v49, %v3996_v23  ;;  %v177_v33 = vadd.f32 %v176_v62, %v64_v20  ;;  %v375_v43 = vadd.f32 %v374_v35, %v97_v28  ;;  %v4201_v44 = vadd.f32 %v380_v36, %v98_v29  ;;  %v1122_v49 = vld [vmem:[#allocation7 + $0x588] sm:$0xff] }
  0x6a   :  { %3421 = vmatpush3.bf16.msra.mxu0 %v3420_v38  ;;  %v183_v34 = vadd.f32 %v182_v26, %v65_v21  ;;  %v369_v38 = vadd.f32 %v368_v32, %v96_v54  ;;  %v196_v55 = vrot.slane %v195_v40, 2  ;;  %v99_v54 = vld [vmem:[#allocation4 + $0x158] sm:$0xff]  ;;  %v1123_v32 = vld [vmem:[#allocation7 + $0x590] sm:$0xff]  ;;  %v3474_v14 = vpack.c.bf16 %v1092_v8, %v1091_v5 }
  0x6b   :  { %3423 = vmatprep.subr.bf16.mxu0 %v3422_v51  ;;  %v745_v27 = vcombine.low %v737_v50, %v744_v19  ;;  %v178_v41 = vrot.slane %v177_v33, 2  ;;  %v190_v51 = vrot.slane %v189_v39, 2  ;;  %v376_v11 = vrot.slane %v375_v43, 2  ;;  %v4308_v5 = vld [vmem:[#allocation7 + $0x450] sm:$0xff] }
  0x6c   :  { %3453 = vmatpush3.bf16.msra.mxu1 %v3452_v63  ;;  %v184_v42 = vrot.slane %v183_v34, 2  ;;  %v370_v59 = vrot.slane %v369_v38, 2  ;;  %v197_v19 = vadd.f32 %v196_v55, %v195_v40  ;;  %v382_v3 = vrot.slane %v4201_v44, 2 }
  0x6d   :  { %3455 = vmatprep.subr.bf16.mxu1 %v3454_v1  ;;  %v863_v37 = vrot.slane %v745_v27, 7  ;;  %v1090_v1 = vld [vmem:[#allocation7 + $0x488] sm:$0xff]  ;;  %v191_v50 = vadd.f32 %v190_v51, %v189_v39  ;;  %v377_v25 = vadd.f32 %v376_v11, %v375_v43  ;;  %v386_v4 = vrot.slane %v99_v54, 4  ;;  %v4247_v39 = vld [vmem:[#allocation7 + $0x510] sm:$0xff]  ;;  %v4251_v43 = vld [vmem:[#allocation7 + $0x420] sm:$0xff] }
  0x6e   :  { %3425 = vmatpush3.bf16.msra.mxu0 %v3424_v0  ;;  %v1089_v0 = vld [vmem:[#allocation7 + $0x480] sm:$0xff]  ;;  %v371_v20 = vadd.f32 %v370_v59, %v369_v38  ;;  %v198_v26 = vrot.slane %v197_v19, 1  ;;  %v383_v40 = vadd.f32 %v382_v3, %v4201_v44  ;;  %v3504_v9 = vpack.c.bf16 %v1106_v30, %v4226_v45  ;;  %v4269_v11 = vld [vmem:[#allocation7 + $0x438] sm:$0xff] }
  0x6f   :  { %3427 = vmatprep.subr.bf16.mxu0 %v3426_v58  ;;  %v864_v48 = vsel %vm853_vm0, %v863_v37, %v609_v24  ;;  %v185_v58 = vadd.f32 %v184_v42, %v183_v34  ;;  %v192_v62 = vrot.slane %v191_v50, 1  ;;  %v3470_v27 = vpack.c.bf16 %v1090_v1, %v1089_v0  ;;  %v1094_v42 = vld [vmem:[#allocation7 + $0x4a8] sm:$0xff]  ;;  %v4259_v0 = vld [vmem:[#allocation7 + $0x520] sm:$0xff]  ;;  %v4306_v30 = vld [vmem:[#allocation7 + $0x4d8] sm:$0xff] }
  0x70   :  { %3457 = vmatpush3.bf16.msra.mxu1 %v3456_v7  ;;  %v865_v63 = vsel %vm855_vm1, %v863_v37, %v864_v48  ;;  %v179_v7 = vadd.f32 %v178_v41, %v177_v33  ;;  %v1124_v33 = vld [vmem:[#allocation7 + $0x598] sm:$0xff]  ;;  %v372_v34 = vrot.slane %v371_v20, 1  ;;  %v378_v35 = vrot.slane %v377_v25, 1  ;;  %v1093_v41 = vld [vmem:[#allocation7 + $0x4a0] sm:$0xff]  ;;  %v1126_v48 = vld [vmem:[#allocation7 + $0x5a8] sm:$0xff] }
  0x71   :  { %3459 = vmatprep.subr.bf16.mxu1 %v3458_v13  ;;  %v866_v61 = vsel %vm857_vm2, %v863_v37, %v865_v63  ;;  %v1121_v13 = vld [vmem:[#allocation7 + $0x580] sm:$0xff]  ;;  %v186_v24 = vrot.slane %v185_v58, 1  ;;  %v4243_v36 = vadd.f32 %v192_v62, %v191_v50  ;;  %v387_v38 = vadd.f32 %v386_v4, %v99_v54  ;;  %v4261_v1 = vld [vmem:[#allocation7 + $0x528] sm:$0xff]  ;;  %v4277_v50 = vld [vmem:[#allocation7 + $0x5b8] sm:$0xff] }
  0x72   :  { %3429 = vmatpush3.bf16.msra.mxu0 %v3428_v12  ;;  %v4212_v12 = vld [vmem:[#allocation7 + $0x408] sm:$0xff]  ;;  %v180_v21 = vrot.slane %v179_v7, 1  ;;  %v3502_v29 = vpack.c.bf16 %v1122_v49, %v1121_v13  ;;  %v3506_v10 = vpack.c.bf16 %v1124_v33, %v1123_v32  ;;  %v4255_v51 = vadd.f32 %v372_v34, %v371_v20  ;;  %v4275_v49 = vld [vmem:[#allocation7 + $0x5b0] sm:$0xff]  ;;  %v4281_v20 = vld [vmem:[#allocation7 + $0x538] sm:$0xff] }
  0x73   :  { %3431 = vmatprep.subr.bf16.mxu0 %v3430_v16  ;;  %v867_v16 = vsel %vm859_vm3, %v863_v37, %v866_v61  ;;  %v3472_v28 = vpack.c.bf16 %v4212_v12, %v4209_v6  ;;  %v4234_v31 = vadd.f32 %v186_v24, %v185_v58  ;;  %v4245_v37 = vadd.f32 %v198_v26, %v197_v19  ;;  %v4263_v6 = vld [vmem:[#allocation7 + $0x4b0] sm:$0xff]  ;;  %v4292_v54 = vld [vmem:[#allocation7 + $0x5c0] sm:$0xff]  ;;  %v4294_v26 = vld [vmem:[#allocation7 + $0x5c8] sm:$0xff] }
  0x74   :  { %3461 = vmatpush3.bf16.msra.mxu1 %v3460_v60  ;;  %v1489_v60 = vrot.slane %v867_v16, %v3996_v23  ;;  %v1482_v53 = vcombine.high %v867_v16, %v867_v16  ;;  %v4257_v44 = vadd.f32 %v378_v35, %v377_v25  ;;  %v384_v55 = vrot.slane %v383_v40, 1  ;;  %v4267_v58 = vld [vmem:[#allocation7 + $0x430] sm:$0xff]  ;;  %v4283_v16 = vld [vmem:[#allocation7 + $0x4c0] sm:$0xff]  ;;  %v4322_v34 = vld [vmem:[#allocation7 + $0x458] sm:$0xff] }
  0x75   :  { %3463 = vmatprep.subr.bf16.mxu1 %v3462_v56  ;;  %v3468_v56 = vpack.c.bf16 %v4205_v47, %v4203_v46  ;;  %v4253_v46 = vld [vmem:[#allocation7 + $0x428] sm:$0xff]  ;;  %v1125_v47 = vld [vmem:[#allocation7 + $0x5a0] sm:$0xff]  ;;  %v388_v59 = vrot.slane %v387_v38, 2  ;;  %v611_v12 = vcombine.low %v4243_v36, %v4245_v37  ;;  %v3478_v13 = vpack.c.bf16 %v1094_v42, %v1093_v41  ;;  %v4279_v19 = vld [vmem:[#allocation7 + $0x530] sm:$0xff] }
  0x76   :  { %3433 = vmatpush3.bf16.msra.mxu0 %v3432_v17  ;;  %v1497_v52 = vcombine.high %v1489_v60, %v1489_v60  ;;  %v1496_v17 = vrot.slane %v1482_v53, %v3996_v23  ;;  %v4290_v53 = vld [vmem:[#allocation7 + $0x448] sm:$0xff]  ;;  %v3510_v62 = vpack.c.bf16 %v1126_v48, %v1125_v47  ;;  %v746_v45 = vcombine.low %v4255_v51, %v4257_v44  ;;  %v4324_v35 = vld [vmem:[#allocation7 + $0x5d0] sm:$0xff]  ;;  %v4326_v3 = vld [vmem:[#allocation7 + $0x5d8] sm:$0xff] }
  0x77   :  { %3435 = vmatprep.subr.bf16.mxu0 %v3434_v2  ;;  %v4232_v2 = vadd.f32 %v180_v21, %v179_v7  ;;  %v4265_v7 = vld [vmem:[#allocation7 + $0x4b8] sm:$0xff]  ;;  %v4285_v21 = vld [vmem:[#allocation7 + $0x4c8] sm:$0xff]  ;;  %v389_v24 = vadd.f32 %v388_v59, %v387_v38  ;;  %v3484_v33 = vpack.c.bf16 %v4269_v11, %v4267_v58  ;;  %v3516_v36 = vpack.c.bf16 %v4281_v20, %v4279_v19  ;;  %v100_v41 = vld [vmem:[#allocation4 + $0x160] sm:$0xff] }
  0x78   :  { %3465 = vmatpush3.bf16.msra.mxu1 %v3464_v57  ;;  %1837 = vmatprep.mubr.f32.mxu0 %v1497_v52  ;;  %v1498_v57 = vcombine.high %v1496_v17, %v1496_v17  ;;  %v3480_v52 = vpack.c.bf16 %v4253_v46, %v4251_v43  ;;  %v3482_v32 = vpack.c.bf16 %v4265_v7, %v4263_v6  ;;  %v101_v48 = vld [vmem:[#allocation4 + $0x168] sm:$0xff]  ;;  %v102_v51 = vld [vmem:[#allocation4 + $0x170] sm:$0xff]  ;;  %v4352_v11 = vld [vmem:[#allocation7 + $0x558] sm:$0xff] }
  0x79   :  { %3467 = vmatprep.subr.bf16.mxu1 %v3466_v22  ;;  %v1076_v22 = vld [vmem:[#allocation7 + $0x418] sm:$0xff]  ;;  %v610_v61 = vcombine.low %v4232_v2, %v4234_v31  ;;  %v4314_v2 = vrot.slane %v611_v12, %v3996_v23  ;;  %v3512_v31 = vpack.c.bf16 %v4261_v1, %v4259_v0  ;;  %v3486_v37 = vpack.c.bf16 %v4285_v21, %v4283_v16  ;;  %v4350_v58 = vld [vmem:[#allocation7 + $0x550] sm:$0xff] }
  0x7a   :  { %3437 = vmatpush3.bf16.msra.mxu0 %v3436_v18  ;;  %1907 = vmatprep.mubr.f32.mxu1 %v1498_v57  ;;  %v1108_v18 = vld [vmem:[#allocation7 + $0x518] sm:$0xff]  ;;  %v3476_v63 = vpack.c.bf16 %v1076_v22, %v1075_v15  ;;  %v3514_v57 = vpack.c.bf16 %v4277_v50, %v4275_v49  ;;  %v68_v15 = vld [vmem:[#allocation4 + $0x60] sm:$0xff]  ;;  %v69_v22 = vld [vmem:[#allocation4 + $0x68] sm:$0xff]  ;;  %v3492_v43 = vpack.c.bf16 %v4322_v34, %v4308_v5  ;;  %v392_v1 = vrot.slane %v100_v41, 4 }
  0x7b   :  { %3471 = vmatprep.subr.bf16.mxu0 %v3470_v27  ;;  %v3508_v25 = vpack.c.bf16 %v1108_v18, %v4247_v39  ;;  %v4298_v27 = vld [vmem:[#allocation7 + $0x548] sm:$0xff]  ;;  %v4311_v8 = vrot.slane %v610_v61, %v3996_v23  ;;  %v3518_v39 = vpack.c.bf16 %v4294_v26, %v4292_v54  ;;  %v71_v18 = vld [vmem:[#allocation4 + $0x78] sm:$0xff]  ;;  %v3522_v46 = vpack.c.bf16 %v4326_v3, %v4324_v35  ;;  %v1101_v54 = vld [vmem:[#allocation7 + $0x4e0] sm:$0xff] }
  0x7c   :  { %3469 = vmatpush3.bf16.msra.mxu1 %v3468_v56  ;;  %v4296_v56 = vld [vmem:[#allocation7 + $0x540] sm:$0xff]  ;;  %v206_v59 = vrot.slane %v69_v22, 4  ;;  %v218_v0 = vrot.slane %v71_v18, 4  ;;  %v398_v6 = vrot.slane %v101_v48, 4  ;;  %v404_v7 = vrot.slane %v102_v51, 4  ;;  %v1088_v35 = vld [vmem:[#allocation7 + $0x478] sm:$0xff] }
  0x7d   :  { %1838 = vmatmul.mubr.f32.vlgmr.msra.gmra.mrb[2].mxu0 %v1489_v60  ;;  %3503 = vmatprep.subr.bf16.mxu1 %v3502_v29  ;;  %v4288_v60 = vld [vmem:[#allocation7 + $0x440] sm:$0xff]  ;;  %v390_v29 = vrot.slane %v389_v24, 1  ;;  %v626_v47 = vcombine.low %v4311_v8, %v4314_v2  ;;  %v393_v19 = vadd.f32 %v392_v1, %v100_v41  ;;  %v103_v41 = vld [vmem:[#allocation4 + $0x178] sm:$0xff]  ;;  %v1135_v3 = vld [vmem:[#allocation7 + $0x5f0] sm:$0xff] }
  0x7e   :  { %3473 = vmatpush3.bf16.msra.mxu0 %v3472_v28  ;;  %v385_v28 = vadd.f32 %v384_v55, %v383_v40  ;;  %v3520_v40 = vpack.c.bf16 %v4298_v27, %v4296_v56  ;;  %v200_v55 = vrot.slane %v68_v15, 4  ;;  %v219_v50 = vadd.f32 %v218_v0, %v71_v18  ;;  %v4392_v1 = vld [vmem:[#allocation7 + $0x570] sm:$0xff]  ;;  %v1154_v5 = vld [vmem:[#allocation7 + $0x688] sm:$0xff] }
  0x7f   :  { %1908 = vmatmul.mubr.f32.vlgmr.msra.gmra.mrb[2].mxu1 %v1496_v17  ;;  %3475 = vmatprep.subr.bf16.mxu0 %v3474_v14  ;;  %v4304_v17 = vld [vmem:[#allocation7 + $0x4d0] sm:$0xff]  ;;  %v391_v4 = vadd.f32 %v390_v29, %v389_v24  ;;  %v3488_v14 = vpack.c.bf16 %v4290_v53, %v4288_v60  ;;  %v399_v20 = vadd.f32 %v398_v6, %v101_v48 }
  0x80   :  { %3505 = vmatpush3.bf16.msra.mxu1 %v3504_v9  ;;  %v754_v9 = vrot.slane %v746_v45, %v3996_v23  ;;  %v3490_v42 = vpack.c.bf16 %v4306_v30, %v4304_v17  ;;  %v201_v12 = vadd.f32 %v200_v55, %v68_v15  ;;  %v405_v16 = vadd.f32 %v404_v7, %v102_v51  ;;  %v4356_v45 = vld [vmem:[#allocation7 + $0x460] sm:$0xff]  ;;  %v4380_v55 = vld [vmem:[#allocation7 + $0x470] sm:$0xff] }
  0x81   :  { %3507 = vmatprep.subr.bf16.mxu1 %v3506_v10  ;;  %v747_v38 = vcombine.low %v385_v28, %v391_v4  ;;  %v70_v10 = vld [vmem:[#allocation4 + $0x70] sm:$0xff]  ;;  %v3524_v53 = vpack.c.bf16 %v4352_v11, %v4350_v58  ;;  %v220_v26 = vrot.slane %v219_v50, 2  ;;  %v394_v28 = vrot.slane %v393_v19, 2  ;;  %v1153_v7 = vld [vmem:[#allocation7 + $0x680] sm:$0xff]  ;;  %v4401_v11 = vld [vmem:[#allocation7 + $0x578] sm:$0xff] }
  0x82   :  { %3477 = vmatpush3.bf16.msra.mxu0 %v3476_v63  ;;  %v212_v63 = vrot.slane %v70_v10, 4  ;;  %v202_v24 = vrot.slane %v201_v12, 2  ;;  %v400_v29 = vrot.slane %v399_v20, 2  ;;  %v410_v58 = vrot.slane %v103_v41, 4 }
  0x83   :  { %3479 = vmatprep.subr.bf16.mxu0 %v3478_v13  ;;  %v761_v44 = vrot.slane %v747_v38, %v3996_v23  ;;  %v207_v13 = vadd.f32 %v206_v59, %v69_v22  ;;  %v4368_v22 = vld [vmem:[#allocation7 + $0x568] sm:$0xff]  ;;  %v1104_v38 = vld [vmem:[#allocation7 + $0x4f8] sm:$0xff] }
  0x84   :  { %3509 = vmatpush3.bf16.msra.mxu1 %v3508_v25  ;;  %v213_v49 = vadd.f32 %v212_v63, %v70_v10  ;;  %v203_v30 = vadd.f32 %v202_v24, %v201_v12  ;;  %v406_v10 = vrot.slane %v405_v16, 2  ;;  %v4405_v12 = vld [vmem:[#allocation7 + $0x788] sm:$0xff] }
  0x85   :  { %3511 = vmatprep.subr.bf16.mxu1 %v3510_v62  ;;  %v762_v61 = vcombine.low %v754_v9, %v761_v44  ;;  %v208_v25 = vrot.slane %v207_v13, 2  ;;  %v1102_v62 = vld [vmem:[#allocation7 + $0x4e8] sm:$0xff] }
  0x86   :  { %3481 = vmatpush3.bf16.msra.mxu0 %v3480_v52  ;;  %v214_v60 = vrot.slane %v213_v49, 2  ;;  %v4358_v52 = vld [vmem:[#allocation7 + $0x468] sm:$0xff]  ;;  %v3494_v15 = vpack.c.bf16 %v1102_v62, %v1101_v54  ;;  %v4427_v54 = vld [vmem:[#allocation7 + $0x698] sm:$0xff]  ;;  %v4429_v62 = vld [vmem:[#allocation7 + $0x610] sm:$0xff] }
  0x87   :  { %3483 = vmatprep.subr.bf16.mxu0 %v3482_v32  ;;  %v870_v21 = vrot.slane %v762_v61, 7  ;;  %v209_v8 = vadd.f32 %v208_v25, %v207_v13  ;;  %v1134_v32 = vld [vmem:[#allocation7 + $0x5e8] sm:$0xff]  ;;  %v4403_v61 = vld [vmem:[#allocation7 + $0x780] sm:$0xff] }
  0x88   :  { %3513 = vmatpush3.bf16.msra.mxu1 %v3512_v31  ;;  %v215_v2 = vadd.f32 %v214_v60, %v213_v49  ;;  %v1133_v31 = vld [vmem:[#allocation7 + $0x5e0] sm:$0xff]  ;;  %v4419_v24 = vld [vmem:[#allocation7 + $0x608] sm:$0xff] }
  0x89   :  { %3515 = vmatprep.subr.bf16.mxu1 %v3514_v57  ;;  %v871_v17 = vsel %vm853_vm0, %v870_v21, %v626_v47  ;;  %v221_v57 = vadd.f32 %v220_v26, %v219_v50  ;;  %v210_v47 = vrot.slane %v209_v8, 1  ;;  %v3526_v44 = vpack.c.bf16 %v1134_v32, %v1133_v31  ;;  %v4421_v25 = vld [vmem:[#allocation7 + $0x700] sm:$0xff]  ;;  %v4423_v60 = vld [vmem:[#allocation7 + $0x708] sm:$0xff] }
  0x8a   :  { %3485 = vmatpush3.bf16.msra.mxu0 %v3484_v33  ;;  %v4361_v33 = vld [vmem:[#allocation7 + $0x560] sm:$0xff]  ;;  %v872_v4 = vsel %vm855_vm1, %v870_v21, %v871_v17  ;;  %v216_v48 = vrot.slane %v215_v2, 1  ;;  %v411_v26 = vadd.f32 %v410_v58, %v103_v41  ;;  %v4436_v17 = vld [vmem:[#allocation7 + $0x798] sm:$0xff]  ;;  %v4444_v31 = vld [vmem:[#allocation7 + $0x6a8] sm:$0xff] }
  0x8b   :  { %3487 = vmatprep.subr.bf16.mxu0 %v3486_v37  ;;  %v4366_v37 = vadd.f32 %v400_v29, %v399_v20  ;;  %v873_v9 = vsel %vm857_vm2, %v870_v21, %v872_v4  ;;  %v222_v51 = vrot.slane %v221_v57, 1  ;;  %v3528_v27 = vpack.c.bf16 %v4368_v22, %v4361_v33  ;;  %v4451_v22 = vld [vmem:[#allocation7 + $0x620] sm:$0xff] }
  0x8c   :  { %3517 = vmatpush3.bf16.msra.mxu1 %v3516_v36  ;;  %v4364_v36 = vadd.f32 %v394_v28, %v393_v19  ;;  %v874_v18 = vsel %vm859_vm3, %v870_v21, %v873_v9  ;;  %v4409_v49 = vadd.f32 %v210_v47, %v209_v8  ;;  %v4411_v50 = vadd.f32 %v216_v48, %v215_v2  ;;  %v4417_v21 = vld [vmem:[#allocation7 + $0x600] sm:$0xff]  ;;  %v4440_v8 = vld [vmem:[#allocation7 + $0x718] sm:$0xff] }
  0x8d   :  { %3519 = vmatprep.subr.bf16.mxu1 %v3518_v39  ;;  %v1103_v39 = vld [vmem:[#allocation7 + $0x4f0] sm:$0xff]  ;;  %v4383_v59 = vrot.slane %v874_v18, %v3996_v23  ;;  %v1499_v56 = vcombine.high %v874_v18, %v874_v18  ;;  %v402_v0 = vrot.slane %v4366_v37, 1  ;;  %v4413_v19 = vadd.f32 %v222_v51, %v221_v57  ;;  %v4442_v2 = vld [vmem:[#allocation7 + $0x6a0] sm:$0xff]  ;;  %v4467_v18 = vld [vmem:[#allocation7 + $0x728] sm:$0xff] }
  0x8e   :  { %3489 = vmatpush3.bf16.msra.mxu0 %v3488_v14  ;;  %v204_v14 = vrot.slane %v203_v30, 1  ;;  %v396_v63 = vrot.slane %v4364_v36, 1  ;;  %v3500_v28 = vpack.c.bf16 %v1088_v35, %v4380_v55  ;;  %v3534_v29 = vpack.c.bf16 %v1154_v5, %v1153_v7  ;;  %v4479_v55 = vld [vmem:[#allocation7 + $0x6b8] sm:$0xff]  ;;  %v4487_v35 = vld [vmem:[#allocation7 + $0x7b0] sm:$0xff]  ;;  %v4500_v58 = vld [vmem:[#allocation7 + $0x6c0] sm:$0xff] }
  0x8f   :  { %3491 = vmatprep.subr.bf16.mxu0 %v3490_v42  ;;  %v3496_v42 = vpack.c.bf16 %v4358_v52, %v4356_v45  ;;  %v1514_v6 = vcombine.high %v4383_v59, %v4383_v59  ;;  %v4397_v34 = vrot.slane %v1499_v56, %v3996_v23  ;;  %v4432_v45 = vld [vmem:[#allocation7 + $0x618] sm:$0xff]  ;;  %v4434_v52 = vld [vmem:[#allocation7 + $0x790] sm:$0xff]  ;;  %v403_v33 = vadd.f32 %v402_v0, %v4366_v37 }
  0x90   :  { %3521 = vmatpush3.bf16.msra.mxu1 %v3520_v40  ;;  %v3498_v40 = vpack.c.bf16 %v1104_v38, %v1103_v39  ;;  %v4407_v13 = vadd.f32 %v204_v14, %v203_v30  ;;  %v4438_v30 = vld [vmem:[#allocation7 + $0x710] sm:$0xff]  ;;  %v397_v32 = vadd.f32 %v396_v63, %v4364_v36  ;;  %v412_v57 = vrot.slane %v411_v26, 2  ;;  %v4453_v39 = vld [vmem:[#allocation7 + $0x628] sm:$0xff]  ;;  %v4455_v38 = vld [vmem:[#allocation7 + $0x7a0] sm:$0xff] }
  0x91   :  { %3523 = vmatprep.subr.bf16.mxu1 %v3522_v46  ;;  %v1136_v46 = vld [vmem:[#allocation7 + $0x5f8] sm:$0xff]  ;;  %1977 = vmatprep.mubr.f32.mxu0 %v1514_v6  ;;  %v628_v36 = vcombine.low %v4411_v50, %v4413_v19  ;;  %v3566_v37 = vpack.c.bf16 %v4405_v12, %v4403_v61  ;;  %v4463_v14 = vld [vmem:[#allocation7 + $0x7a8] sm:$0xff]  ;;  %v3536_v47 = vpack.c.bf16 %v4419_v24, %v4417_v21  ;;  %v4481_v56 = vld [vmem:[#allocation7 + $0x630] sm:$0xff] }
  0x92   :  { %3493 = vmatpush3.bf16.msra.mxu0 %v3492_v43  ;;  %v4399_v43 = vadd.f32 %v406_v10, %v405_v16  ;;  %v3530_v20 = vpack.c.bf16 %v1136_v46, %v1135_v3  ;;  %v1515_v16 = vcombine.high %v4397_v34, %v4397_v34  ;;  %v627_v9 = vcombine.low %v4407_v13, %v4409_v49  ;;  %v4465_v10 = vld [vmem:[#allocation7 + $0x720] sm:$0xff]  ;;  %v4489_v3 = vld [vmem:[#allocation7 + $0x7b8] sm:$0xff]  ;;  %v4496_v7 = vld [vmem:[#allocation7 + $0x730] sm:$0xff] }
  0x93   :  { %3495 = vmatprep.subr.bf16.mxu0 %v3494_v15  ;;  %v3532_v15 = vpack.c.bf16 %v4401_v11, %v4392_v1  ;;  %v413_v41 = vadd.f32 %v412_v57, %v411_v26  ;;  %v3568_v48 = vpack.c.bf16 %v4423_v60, %v4421_v25  ;;  %v763_v0 = vcombine.low %v397_v32, %v403_v33  ;;  %v4498_v5 = vld [vmem:[#allocation7 + $0x738] sm:$0xff]  ;;  %v4513_v13 = vld [vmem:[#allocation7 + $0x6c8] sm:$0xff]  ;;  %v72_v50 = vld [vmem:[#allocation4 + $0x80] sm:$0xff] }
  0x94   :  { %3525 = vmatpush3.bf16.msra.mxu1 %v3524_v53  ;;  %v4425_v53 = vld [vmem:[#allocation7 + $0x690] sm:$0xff]  ;;  %2047 = vmatprep.mubr.f32.mxu1 %v1515_v16  ;;  %v408_v4 = vrot.slane %v4399_v43, 1  ;;  %v3572_v1 = vpack.c.bf16 %v4440_v8, %v4438_v30  ;;  %v3542_v6 = vpack.c.bf16 %v4444_v31, %v4442_v2  ;;  %v4503_v11 = vrot.slane %v627_v9, %v3996_v23  ;;  %v73_v19 = vld [vmem:[#allocation4 + $0x88] sm:$0xff]  ;;  %v75_v25 = vld [vmem:[#allocation4 + $0x98] sm:$0xff] }
  0x95   :  { %3527 = vmatprep.subr.bf16.mxu1 %v3526_v44  ;;  %v3538_v51 = vpack.c.bf16 %v4427_v54, %v4425_v53  ;;  %v4477_v44 = vld [vmem:[#allocation7 + $0x6b0] sm:$0xff]  ;;  %v414_v63 = vrot.slane %v413_v41, 1  ;;  %v3544_v61 = vpack.c.bf16 %v4453_v39, %v4451_v22  ;;  %v3574_v12 = vpack.c.bf16 %v4463_v14, %v4455_v38  ;;  %v104_v60 = vld [vmem:[#allocation4 + $0x180] sm:$0xff]  ;;  %v105_v26 = vld [vmem:[#allocation4 + $0x188] sm:$0xff] }
  0x96   :  { %3497 = vmatpush3.bf16.msra.mxu0 %v3496_v42  ;;  %v3540_v42 = vpack.c.bf16 %v4432_v45, %v4429_v62  ;;  %v409_v46 = vadd.f32 %v408_v4, %v4399_v43  ;;  %v4506_v43 = vrot.slane %v628_v36, %v3996_v23  ;;  %v3546_v16 = vpack.c.bf16 %v4479_v55, %v4477_v44  ;;  %v74_v24 = vld [vmem:[#allocation4 + $0x90] sm:$0xff]  ;;  %v4534_v22 = vld [vmem:[#allocation7 + $0x648] sm:$0xff] }
  0x97   :  { %3499 = vmatprep.subr.bf16.mxu0 %v3498_v40  ;;  %v4485_v40 = vld [vmem:[#allocation7 + $0x638] sm:$0xff]  ;;  %v415_v49 = vadd.f32 %v414_v63, %v413_v41  ;;  %v3578_v21 = vpack.c.bf16 %v4489_v3, %v4487_v35  ;;  %v3580_v53 = vpack.c.bf16 %v4498_v5, %v4496_v7  ;;  %v771_v62 = vrot.slane %v763_v0, %v3996_v23  ;;  %v4538_v63 = vld [vmem:[#allocation7 + $0x740] sm:$0xff]  ;;  %v4540_v0 = vld [vmem:[#allocation7 + $0x748] sm:$0xff] }
  0x98   :  { %3529 = vmatpush3.bf16.msra.mxu1 %v3528_v27  ;;  %v3570_v27 = vpack.c.bf16 %v4436_v17, %v4434_v52  ;;  %v3550_v45 = vpack.c.bf16 %v4513_v13, %v4500_v58  ;;  %v643_v52 = vcombine.low %v4503_v11, %v4506_v43  ;;  %v230_v17 = vrot.slane %v73_v19, 4  ;;  %v1147_v3 = vld [vmem:[#allocation7 + $0x650] sm:$0xff]  ;;  %v1165_v58 = vld [vmem:[#allocation7 + $0x6e0] sm:$0xff]  ;;  %v1166_v13 = vld [vmem:[#allocation7 + $0x6e8] sm:$0xff] }
  0x99   :  { %3531 = vmatprep.subr.bf16.mxu1 %v3530_v20  ;;  %v3576_v20 = vpack.c.bf16 %v4467_v18, %v4465_v10  ;;  %v764_v54 = vcombine.low %v409_v46, %v415_v49  ;;  %v236_v30 = vrot.slane %v74_v24, 4  ;;  %v242_v2 = vrot.slane %v75_v25, 4  ;;  %v4542_v49 = vld [vmem:[#allocation7 + $0x7d0] sm:$0xff] }
  0x9a   :  { %3501 = vmatpush3.bf16.msra.mxu0 %v3500_v28  ;;  %v106_v28 = vld [vmem:[#allocation4 + $0x190] sm:$0xff]  ;;  %v416_v31 = vrot.slane %v104_v60, 4  ;;  %v231_v32 = vadd.f32 %v230_v17, %v73_v19  ;;  %v422_v4 = vrot.slane %v105_v26, 4  ;;  %v3584_v10 = vpack.c.bf16 %v4540_v0, %v4538_v63  ;;  %v4626_v63 = vld [vmem:[#allocation7 + $0x880] sm:$0xff]  ;;  %v4628_v0 = vld [vmem:[#allocation7 + $0x888] sm:$0xff] }
  0x9b   :  { %3535 = vmatprep.subr.bf16.mxu0 %v3534_v29  ;;  %v224_v29 = vrot.slane %v72_v50, 4  ;;  %v237_v33 = vadd.f32 %v236_v30, %v74_v24  ;;  %v428_v57 = vrot.slane %v106_v28, 4  ;;  %v243_v9 = vadd.f32 %v242_v2, %v75_v25  ;;  %v4568_v30 = vld [vmem:[#allocation7 + $0x750] sm:$0xff] }
  0x9c   :  { %3533 = vmatpush3.bf16.msra.mxu1 %v3532_v15  ;;  %v4532_v15 = vld [vmem:[#allocation7 + $0x640] sm:$0xff]  ;;  %v417_v36 = vadd.f32 %v416_v31, %v104_v60  ;;  %v423_v41 = vadd.f32 %v422_v4, %v105_v26  ;;  %v4587_v4 = vld [vmem:[#allocation7 + $0x668] sm:$0xff] }
  0x9d   :  { %1978 = vmatmul.mubr.f32.vlgmr.msra.gmra.mrb[4].mxu0 %v4383_v59  ;;  %3567 = vmatprep.subr.bf16.mxu1 %v3566_v37  ;;  %v3548_v59 = vpack.c.bf16 %v4485_v40, %v4481_v56  ;;  %v225_v8 = vadd.f32 %v224_v29, %v72_v50  ;;  %v232_v37 = vrot.slane %v231_v32, 2  ;;  %v238_v14 = vrot.slane %v237_v33, 2  ;;  %v4544_v50 = vld [vmem:[#allocation7 + $0x7d8] sm:$0xff] }
  0x9e   :  { %3537 = vmatpush3.bf16.msra.mxu0 %v3536_v47  ;;  %v429_v47 = vadd.f32 %v428_v57, %v106_v28  ;;  %v244_v55 = vrot.slane %v243_v9, 2  ;;  %v3552_v46 = vpack.c.bf16 %v4534_v22, %v4532_v15  ;;  %v424_v43 = vrot.slane %v423_v41, 2  ;;  %v107_v29 = vld [vmem:[#allocation4 + $0x198] sm:$0xff]  ;;  %v4589_v57 = vld [vmem:[#allocation7 + $0x7e0] sm:$0xff]  ;;  %v4591_v15 = vld [vmem:[#allocation7 + $0x7e8] sm:$0xff] }
  0x9f   :  { %2048 = vmatmul.mubr.f32.vlgmr.msra.gmra.mrb[4].mxu1 %v4397_v34  ;;  %3539 = vmatprep.subr.bf16.mxu0 %v3538_v51  ;;  %v778_v34 = vrot.slane %v764_v54, %v3996_v23  ;;  %v226_v38 = vrot.slane %v225_v8, 2  ;;  %v1194_v51 = vld [vmem:[#allocation7 + $0x7c8] sm:$0xff]  ;;  %v239_v11 = vadd.f32 %v238_v14, %v237_v33  ;;  %v4585_v33 = vld [vmem:[#allocation7 + $0x660] sm:$0xff]  ;;  %v4610_v14 = vld [vmem:[#allocation7 + $0x670] sm:$0xff] }
  0xa0   :  { %3569 = vmatpush3.bf16.msra.mxu1 %v3568_v48  ;;  %v1193_v48 = vld [vmem:[#allocation7 + $0x7c0] sm:$0xff]  ;;  %v245_v24 = vadd.f32 %v244_v55, %v243_v9  ;;  %v4604_v9 = vld [vmem:[#allocation7 + $0x768] sm:$0xff] }
  0xa1   :  { %3571 = vmatprep.subr.bf16.mxu1 %v3570_v27  ;;  %v779_v39 = vcombine.low %v771_v62, %v778_v34  ;;  %v227_v44 = vadd.f32 %v226_v38, %v225_v8  ;;  %v418_v27 = vrot.slane %v417_v36, 2  ;;  %v425_v62 = vadd.f32 %v424_v43, %v423_v41  ;;  %v4579_v8 = vld [vmem:[#allocation7 + $0x758] sm:$0xff]  ;;  %v4602_v38 = vld [vmem:[#allocation7 + $0x760] sm:$0xff] }
  0xa2   :  { %3541 = vmatpush3.bf16.msra.mxu0 %v3540_v42  ;;  %v3582_v26 = vpack.c.bf16 %v1194_v51, %v1193_v48  ;;  %v246_v17 = vrot.slane %v245_v24, 1  ;;  %v3558_v48 = vpack.c.bf16 %v1166_v13, %v1165_v58  ;;  %v4614_v51 = vld [vmem:[#allocation7 + $0x678] sm:$0xff] }
  0xa3   :  { %3543 = vmatprep.subr.bf16.mxu0 %v3542_v6  ;;  %v877_v42 = vrot.slane %v779_v39, 7  ;;  %v233_v6 = vadd.f32 %v232_v37, %v231_v32  ;;  %v4547_v25 = vadd.f32 %v418_v27, %v417_v36  ;;  %v426_v2 = vrot.slane %v425_v62, 1  ;;  %v4606_v36 = vld [vmem:[#allocation7 + $0x6f0] sm:$0xff]  ;;  %v4608_v37 = vld [vmem:[#allocation7 + $0x6f8] sm:$0xff] }
  0xa4   :  { %3573 = vmatpush3.bf16.msra.mxu1 %v3572_v1  ;;  %v1163_v1 = vld [vmem:[#allocation7 + $0x6d0] sm:$0xff]  ;;  %v434_v32 = vrot.slane %v107_v29, 4  ;;  %v4600_v22 = vadd.f32 %v246_v17, %v245_v24  ;;  %v4646_v24 = vld [vmem:[#allocation7 + $0x900] sm:$0xff] }
  0xa5   :  { %3575 = vmatprep.subr.bf16.mxu1 %v3574_v12  ;;  %v1164_v12 = vld [vmem:[#allocation7 + $0x6d8] sm:$0xff]  ;;  %v878_v19 = vsel %vm853_vm0, %v877_v42, %v643_v52  ;;  %v234_v54 = vrot.slane %v233_v6, 1  ;;  %v240_v52 = vrot.slane %v239_v11, 1  ;;  %v420_v34 = vrot.slane %v4547_v25, 1  ;;  %v4622_v27 = vld [vmem:[#allocation7 + $0x770] sm:$0xff] }
  0xa6   :  { %3545 = vmatpush3.bf16.msra.mxu0 %v3544_v61  ;;  %v228_v61 = vrot.slane %v227_v44, 1  ;;  %v879_v60 = vsel %vm855_vm1, %v877_v42, %v878_v19  ;;  %v3554_v18 = vpack.c.bf16 %v1164_v12, %v1163_v1  ;;  %v435_v41 = vadd.f32 %v434_v32, %v107_v29  ;;  %v4642_v19 = vld [vmem:[#allocation7 + $0x980] sm:$0xff]  ;;  %v4662_v29 = vld [vmem:[#allocation7 + $0x818] sm:$0xff]  ;;  %v4693_v32 = vld [vmem:[#allocation7 + $0x828] sm:$0xff] }
  0xa7   :  { %3547 = vmatprep.subr.bf16.mxu0 %v3546_v16  ;;  %v430_v16 = vrot.slane %v429_v47, 2  ;;  %v880_v28 = vsel %vm857_vm2, %v877_v42, %v879_v60  ;;  %v4631_v1 = vadd.f32 %v420_v34, %v4547_v25  ;;  %v3590_v12 = vpack.c.bf16 %v4591_v15, %v4589_v57  ;;  %v4648_v25 = vld [vmem:[#allocation7 + $0x908] sm:$0xff]  ;;  %v4684_v34 = vld [vmem:[#allocation7 + $0x820] sm:$0xff] }
  0xa8   :  { %3577 = vmatpush3.bf16.msra.mxu1 %v3576_v20  ;;  %v3586_v20 = vpack.c.bf16 %v4544_v50, %v4542_v49  ;;  %v881_v35 = vsel %vm859_vm3, %v877_v42, %v880_v28  ;;  %v4616_v42 = vld [vmem:[#allocation7 + $0x7f0] sm:$0xff]  ;;  %v436_v43 = vrot.slane %v435_v41, 2  ;;  %v4638_v49 = vld [vmem:[#allocation7 + $0x800] sm:$0xff]  ;;  %v4640_v50 = vld [vmem:[#allocation7 + $0x808] sm:$0xff] }
  0xa9   :  { %3579 = vmatprep.subr.bf16.mxu1 %v3578_v21  ;;  %v1148_v21 = vld [vmem:[#allocation7 + $0x658] sm:$0xff]  ;;  %v4571_v56 = vrot.slane %v881_v35, %v3996_v23  ;;  %v1516_v40 = vcombine.high %v881_v35, %v881_v35  ;;  %v4583_v31 = vadd.f32 %v430_v16, %v429_v47  ;;  %v3588_v47 = vpack.c.bf16 %v4579_v8, %v4568_v30  ;;  %v4656_v16 = vld [vmem:[#allocation7 + $0x890] sm:$0xff] }
  0xaa   :  { %3549 = vmatpush3.bf16.msra.mxu0 %v3548_v59  ;;  %v4573_v59 = vadd.f32 %v228_v61, %v227_v44  ;;  %v3556_v39 = vpack.c.bf16 %v1148_v21, %v1147_v3  ;;  %v4618_v44 = vld [vmem:[#allocation7 + $0x7f8] sm:$0xff]  ;;  %v4644_v61 = vld [vmem:[#allocation7 + $0x988] sm:$0xff]  ;;  %v4660_v28 = vld [vmem:[#allocation7 + $0x810] sm:$0xff]  ;;  %v437_v17 = vadd.f32 %v436_v43, %v435_v41  ;;  %v3600_v15 = vpack.c.bf16 %v4640_v50, %v4638_v49 }
  0xab   :  { %3551 = vmatprep.subr.bf16.mxu0 %v3550_v45  ;;  %v4581_v45 = vadd.f32 %v234_v54, %v233_v6  ;;  %v1531_v7 = vcombine.high %v4571_v56, %v4571_v56  ;;  %v4596_v5 = vrot.slane %v1516_v40, %v3996_v23  ;;  %v4633_v6 = vadd.f32 %v426_v2, %v425_v62  ;;  %v4672_v35 = vld [vmem:[#allocation7 + $0x998] sm:$0xff]  ;;  %v4674_v3 = vld [vmem:[#allocation7 + $0x910] sm:$0xff]  ;;  %v4680_v40 = vld [vmem:[#allocation7 + $0x8a0] sm:$0xff] }
  0xac   :  { %3581 = vmatpush3.bf16.msra.mxu1 %v3580_v53  ;;  %v4598_v53 = vadd.f32 %v240_v52, %v239_v11  ;;  %v432_v11 = vrot.slane %v4583_v31, 1  ;;  %v3560_v62 = vpack.c.bf16 %v4587_v4, %v4585_v33  ;;  %v4664_v52 = vld [vmem:[#allocation7 + $0x990] sm:$0xff]  ;;  %v4676_v21 = vld [vmem:[#allocation7 + $0x918] sm:$0xff]  ;;  %v3594_v30 = vpack.c.bf16 %v4618_v44, %v4616_v42  ;;  %v4695_v33 = vld [vmem:[#allocation7 + $0x9a0] sm:$0xff] }
  0xad   :  { %3583 = vmatprep.subr.bf16.mxu1 %v3582_v26  ;;  %2117 = vmatprep.mubr.f32.mxu0 %v1531_v7  ;;  %v1532_v55 = vcombine.high %v4596_v5, %v4596_v5  ;;  %v644_v60 = vcombine.low %v4573_v59, %v4581_v45  ;;  %v4658_v26 = vld [vmem:[#allocation7 + $0x898] sm:$0xff]  ;;  %v4682_v59 = vld [vmem:[#allocation7 + $0x8a8] sm:$0xff]  ;;  %v438_v58 = vrot.slane %v437_v17, 1  ;;  %v780_v13 = vcombine.low %v4631_v1, %v4633_v6 }
  0xae   :  { %3553 = vmatpush3.bf16.msra.mxu0 %v3552_v46  ;;  %v4624_v46 = vld [vmem:[#allocation7 + $0x778] sm:$0xff]  ;;  %v645_v54 = vcombine.low %v4598_v53, %v4600_v22  ;;  %v433_v8 = vadd.f32 %v432_v11, %v4583_v31  ;;  %v3598_v2 = vpack.c.bf16 %v4628_v0, %v4626_v63  ;;  %v4697_v4 = vld [vmem:[#allocation7 + $0x9a8] sm:$0xff]  ;;  %v3630_v7 = vpack.c.bf16 %v4644_v61, %v4642_v19  ;;  %v4711_v22 = vld [vmem:[#allocation7 + $0x920] sm:$0xff] }
  0xaf   :  { %3555 = vmatprep.subr.bf16.mxu0 %v3554_v18  ;;  %2187 = vmatprep.mubr.f32.mxu1 %v1532_v55  ;;  %v3562_v18 = vpack.c.bf16 %v4608_v37, %v4606_v36  ;;  %v3596_v45 = vpack.c.bf16 %v4624_v46, %v4622_v27  ;;  %v4700_v57 = vrot.slane %v644_v60, %v3996_v23  ;;  %v108_v46 = vld [vmem:[#allocation4 + $0x1a0] sm:$0xff]  ;;  %v109_v63 = vld [vmem:[#allocation4 + $0x1a8] sm:$0xff]  ;;  %v110_v0 = vld [vmem:[#allocation4 + $0x1b0] sm:$0xff] }
  0xb0   :  { %3585 = vmatpush3.bf16.msra.mxu1 %v3584_v10  ;;  %v3592_v10 = vpack.c.bf16 %v4604_v9, %v4602_v38  ;;  %v4703_v31 = vrot.slane %v645_v54, %v3996_v23  ;;  %v3632_v53 = vpack.c.bf16 %v4648_v25, %v4646_v24  ;;  %v439_v38 = vadd.f32 %v438_v58, %v437_v17  ;;  %v76_v9 = vld [vmem:[#allocation4 + $0xa0] sm:$0xff]  ;;  %v1223_v58 = vld [vmem:[#allocation7 + $0x8b0] sm:$0xff] }
  0xb1   :  { %3587 = vmatprep.subr.bf16.mxu1 %v3586_v20  ;;  %v3564_v20 = vpack.c.bf16 %v4614_v51, %v4610_v14  ;;  %v3602_v36 = vpack.c.bf16 %v4658_v26, %v4656_v16  ;;  %v3604_v37 = vpack.c.bf16 %v4662_v29, %v4660_v28  ;;  %v3634_v14 = vpack.c.bf16 %v4672_v35, %v4664_v52  ;;  %v79_v51 = vld [vmem:[#allocation4 + $0xb8] sm:$0xff]  ;;  %v1225_v28 = vld [vmem:[#allocation7 + $0x8c0] sm:$0xff]  ;;  %v1226_v29 = vld [vmem:[#allocation7 + $0x8c8] sm:$0xff] }
  0xb2   :  { %3557 = vmatpush3.bf16.msra.mxu0 %v3556_v39  ;;  %v4713_v39 = vld [vmem:[#allocation7 + $0x928] sm:$0xff]  ;;  %v3636_v41 = vpack.c.bf16 %v4676_v21, %v4674_v3  ;;  %v3606_v42 = vpack.c.bf16 %v4682_v59, %v4680_v40  ;;  %v3608_v44 = vpack.c.bf16 %v4693_v32, %v4684_v34  ;;  %v781_v55 = vcombine.low %v433_v8, %v439_v38  ;;  %v1255_v38 = vld [vmem:[#allocation7 + $0x9b0] sm:$0xff]  ;;  %v1228_v32 = vld [vmem:[#allocation7 + $0x8d8] sm:$0xff] }
  0xb3   :  { %3559 = vmatprep.subr.bf16.mxu0 %v3558_v48  ;;  %v78_v48 = vld [vmem:[#allocation4 + $0xb0] sm:$0xff]  ;;  %v788_v27 = vrot.slane %v780_v13, %v3996_v23  ;;  %v3638_v1 = vpack.c.bf16 %v4697_v4, %v4695_v33  ;;  %v3640_v6 = vpack.c.bf16 %v4713_v39, %v4711_v22  ;;  %v660_v11 = vcombine.low %v4700_v57, %v4703_v31  ;;  %v1224_v13 = vld [vmem:[#allocation7 + $0x8b8] sm:$0xff]  ;;  %v1258_v33 = vld [vmem:[#allocation7 + $0x9c8] sm:$0xff] }
  0xb4   :  { %3589 = vmatpush3.bf16.msra.mxu1 %v3588_v47  ;;  %v77_v47 = vld [vmem:[#allocation4 + $0xa8] sm:$0xff]  ;;  %v248_v43 = vrot.slane %v76_v9, 4  ;;  %v260_v50 = vrot.slane %v78_v48, 4  ;;  %v266_v19 = vrot.slane %v79_v51, 4  ;;  %v440_v24 = vrot.slane %v108_v46, 4  ;;  %v1227_v34 = vld [vmem:[#allocation7 + $0x8d0] sm:$0xff] }
  0xb5   :  { %3591 = vmatprep.subr.bf16.mxu1 %v3590_v12  ;;  %v795_v12 = vrot.slane %v781_v55, %v3996_v23  ;;  %v254_v49 = vrot.slane %v77_v47, 4  ;;  %v446_v25 = vrot.slane %v109_v63, 4  ;;  %v452_v60 = vrot.slane %v110_v0, 4  ;;  %v4803_v22 = vld [vmem:[#allocation7 + $0x950] sm:$0xff]  ;;  %v4805_v39 = vld [vmem:[#allocation7 + $0x958] sm:$0xff] }
  0xb6   :  { %3561 = vmatpush3.bf16.msra.mxu0 %v3560_v62  ;;  %v249_v61 = vadd.f32 %v248_v43, %v76_v9  ;;  %v261_v16 = vadd.f32 %v260_v50, %v78_v48  ;;  %v267_v26 = vadd.f32 %v266_v19, %v79_v51  ;;  %v441_v17 = vadd.f32 %v440_v24, %v108_v46  ;;  %v1240_v19 = vld [vmem:[#allocation7 + $0x938] sm:$0xff] }
  0xb7   :  { %3563 = vmatprep.subr.bf16.mxu0 %v3562_v18  ;;  %v796_v54 = vcombine.low %v788_v27, %v795_v12  ;;  %v255_v62 = vadd.f32 %v254_v49, %v77_v47  ;;  %v453_v18 = vadd.f32 %v452_v60, %v110_v0  ;;  %v111_v49 = vld [vmem:[#allocation4 + $0x1b8] sm:$0xff]  ;;  %v1257_v60 = vld [vmem:[#allocation7 + $0x9c0] sm:$0xff] }
  0xb8   :  { %3593 = vmatpush3.bf16.msra.mxu1 %v3592_v10  ;;  %v250_v52 = vrot.slane %v249_v61, 2  ;;  %v447_v10 = vadd.f32 %v446_v25, %v109_v63  ;;  %v268_v8 = vrot.slane %v267_v26, 2  ;;  %v442_v57 = vrot.slane %v441_v17, 2  ;;  %v4775_v25 = vld [vmem:[#allocation7 + $0x848] sm:$0xff] }
  0xb9   :  { %3595 = vmatprep.subr.bf16.mxu1 %v3594_v30  ;;  %v256_v35 = vrot.slane %v255_v62, 2  ;;  %v262_v30 = vrot.slane %v261_v16, 2  ;;  %v454_v31 = vrot.slane %v453_v18, 2 }
  0xba   :  { %3565 = vmatpush3.bf16.msra.mxu0 %v3564_v20  ;;  %v884_v20 = vrot.slane %v796_v54, 7  ;;  %v269_v51 = vadd.f32 %v268_v8, %v267_v26  ;;  %v443_v55 = vadd.f32 %v442_v57, %v441_v17  ;;  %v4784_v26 = vld [vmem:[#allocation7 + $0x940] sm:$0xff]  ;;  %v4791_v17 = vld [vmem:[#allocation7 + $0x850] sm:$0xff]  ;;  %v3646_v8 = vpack.c.bf16 %v1258_v33, %v1257_v60 }
  0xbb   :  { %3599 = vmatprep.subr.bf16.mxu0 %v3598_v2  ;;  %v251_v2 = vadd.f32 %v250_v52, %v249_v61  ;;  %v257_v47 = vadd.f32 %v256_v35, %v255_v62  ;;  %v263_v48 = vadd.f32 %v262_v30, %v261_v16  ;;  %v4764_v61 = vld [vmem:[#allocation7 + $0x840] sm:$0xff]  ;;  %v4782_v54 = vadd.f32 %v454_v31, %v453_v18  ;;  %v4786_v52 = vld [vmem:[#allocation7 + $0x948] sm:$0xff]  ;;  %v4795_v18 = vld [vmem:[#allocation7 + $0x9d0] sm:$0xff] }
  0xbc   :  { %3597 = vmatpush3.bf16.msra.mxu1 %v3596_v45  ;;  %v4737_v45 = vld [vmem:[#allocation7 + $0x830] sm:$0xff]  ;;  %v885_v9 = vsel %vm853_vm0, %v884_v20, %v660_v11  ;;  %v270_v0 = vrot.slane %v269_v51, 1  ;;  %v3610_v11 = vpack.c.bf16 %v1224_v13, %v1223_v58  ;;  %v444_v59 = vrot.slane %v443_v55, 1  ;;  %v4801_v58 = vld [vmem:[#allocation7 + $0x9d8] sm:$0xff]  ;;  %v4815_v57 = vld [vmem:[#allocation7 + $0x860] sm:$0xff] }
  0xbd   :  { %2118 = vmatmul.mubr.f32.vlgmr.msra.gmra.mrb[6].mxu0 %v4571_v56  ;;  %3631 = vmatprep.subr.bf16.mxu1 %v3630_v7  ;;  %v448_v56 = vrot.slane %v447_v10, 2  ;;  %v4739_v7 = vld [vmem:[#allocation7 + $0x838] sm:$0xff]  ;;  %v258_v46 = vrot.slane %v257_v47, 1  ;;  %v264_v63 = vrot.slane %v263_v48, 1  ;;  %v458_v62 = vrot.slane %v111_v49, 4  ;;  %v4819_v31 = vld [vmem:[#allocation7 + $0x9e0] sm:$0xff] }
  0xbe   :  { %3601 = vmatpush3.bf16.msra.mxu0 %v3600_v15  ;;  %v1256_v15 = vld [vmem:[#allocation7 + $0x9b8] sm:$0xff]  ;;  %v4770_v21 = vadd.f32 %v270_v0, %v269_v51  ;;  %v3614_v16 = vpack.c.bf16 %v1226_v29, %v1225_v28  ;;  %v3616_v30 = vpack.c.bf16 %v4775_v25, %v4764_v61  ;;  %v3652_v28 = vpack.c.bf16 %v4805_v39, %v4803_v22  ;;  %v4856_v29 = vld [vmem:[#allocation7 + $0xa80] sm:$0xff]  ;;  %v4868_v61 = vld [vmem:[#allocation7 + $0xb88] sm:$0xff] }
  0xbf   :  { %2188 = vmatmul.mubr.f32.vlgmr.msra.gmra.mrb[6].mxu1 %v4596_v5  ;;  %3603 = vmatprep.subr.bf16.mxu0 %v3602_v36  ;;  %v886_v5 = vsel %vm855_vm1, %v884_v20, %v885_v9  ;;  %v252_v36 = vrot.slane %v251_v2, 1  ;;  %v449_v27 = vadd.f32 %v448_v56, %v447_v10  ;;  %v3642_v43 = vpack.c.bf16 %v1256_v15, %v1255_v38  ;;  %v4793_v10 = vld [vmem:[#allocation7 + $0x858] sm:$0xff]  ;;  %v4817_v56 = vld [vmem:[#allocation7 + $0x868] sm:$0xff]  ;;  %v4823_v38 = vld [vmem:[#allocation7 + $0x960] sm:$0xff] }
  0xc0   :  { %3633 = vmatpush3.bf16.msra.mxu1 %v3632_v53  ;;  %v887_v53 = vsel %vm857_vm2, %v884_v20, %v886_v5  ;;  %v4766_v24 = vadd.f32 %v258_v46, %v257_v47  ;;  %v4768_v3 = vadd.f32 %v264_v63, %v263_v48  ;;  %v459_v35 = vadd.f32 %v458_v62, %v111_v49  ;;  %v4825_v15 = vld [vmem:[#allocation7 + $0x968] sm:$0xff]  ;;  %v4840_v46 = vld [vmem:[#allocation7 + $0x9f0] sm:$0xff]  ;;  %v4844_v0 = vld [vmem:[#allocation7 + $0x9f8] sm:$0xff] }
  0xc1   :  { %3635 = vmatprep.subr.bf16.mxu1 %v3634_v14  ;;  %v3612_v14 = vpack.c.bf16 %v4739_v7, %v4737_v45  ;;  %v888_v12 = vsel %vm859_vm3, %v884_v20, %v887_v53  ;;  %v4759_v40 = vadd.f32 %v252_v36, %v251_v2  ;;  %v4811_v45 = vld [vmem:[#allocation7 + $0x8e0] sm:$0xff]  ;;  %v4813_v2 = vld [vmem:[#allocation7 + $0x8e8] sm:$0xff]  ;;  %v456_v9 = vrot.slane %v4782_v54, 1  ;;  %v4832_v36 = vld [vmem:[#allocation7 + $0x8f0] sm:$0xff] }
  0xc2   :  { %3605 = vmatpush3.bf16.msra.mxu0 %v3604_v37  ;;  %v4757_v37 = vrot.slane %v888_v12, %v3996_v23  ;;  %v1533_v50 = vcombine.high %v888_v12, %v888_v12  ;;  %v4821_v7 = vld [vmem:[#allocation7 + $0x9e8] sm:$0xff]  ;;  %v460_v47 = vrot.slane %v459_v35, 2  ;;  %v662_v51 = vcombine.low %v4768_v3, %v4770_v21  ;;  %v4838_v53 = vld [vmem:[#allocation7 + $0x878] sm:$0xff]  ;;  %v114_v22 = vld [vmem:[#allocation4 + $0x1d0] sm:$0xff] }
  0xc3   :  { %3607 = vmatprep.subr.bf16.mxu0 %v3606_v42  ;;  %v1239_v42 = vld [vmem:[#allocation7 + $0x930] sm:$0xff]  ;;  %v661_v48 = vcombine.low %v4759_v40, %v4766_v24  ;;  %v3618_v5 = vpack.c.bf16 %v1228_v32, %v1227_v34  ;;  %v3648_v63 = vpack.c.bf16 %v4786_v52, %v4784_v26  ;;  %v3620_v12 = vpack.c.bf16 %v4793_v10, %v4791_v17  ;;  %v4860_v40 = vld [vmem:[#allocation7 + $0xa00] sm:$0xff]  ;;  %v4887_v62 = vld [vmem:[#allocation7 + $0xb08] sm:$0xff] }
  0xc4   :  { %3637 = vmatpush3.bf16.msra.mxu1 %v3636_v41  ;;  %v450_v41 = vrot.slane %v449_v27, 1  ;;  %v1548_v4 = vcombine.high %v4757_v37, %v4757_v37  ;;  %v3650_v49 = vpack.c.bf16 %v4801_v58, %v4795_v18  ;;  %v457_v24 = vadd.f32 %v456_v9, %v4782_v54  ;;  %v4885_v54 = vld [vmem:[#allocation7 + $0xb00] sm:$0xff]  ;;  %v82_v17 = vld [vmem:[#allocation4 + $0xd0] sm:$0xff]  ;;  %v83_v10 = vld [vmem:[#allocation4 + $0xd8] sm:$0xff] }
  0xc5   :  { %3639 = vmatprep.subr.bf16.mxu1 %v3638_v1  ;;  %v4780_v1 = vrot.slane %v1533_v50, %v3996_v23  ;;  %v4858_v50 = vld [vmem:[#allocation7 + $0xa88] sm:$0xff]  ;;  %v4872_v21 = vrot.slane %v661_v48, %v3996_v23  ;;  %v3622_v25 = vpack.c.bf16 %v4813_v2, %v4811_v45  ;;  %v3624_v60 = vpack.c.bf16 %v4817_v56, %v4815_v57  ;;  %v4911_v48 = vld [vmem:[#allocation7 + $0xa98] sm:$0xff] }
  0xc6   :  { %3609 = vmatpush3.bf16.msra.mxu0 %v3608_v44  ;;  %v3644_v44 = vpack.c.bf16 %v1240_v19, %v1239_v42  ;;  %2257 = vmatprep.mubr.f32.mxu0 %v1548_v4  ;;  %v4809_v13 = vadd.f32 %v450_v41, %v449_v27  ;;  %v4836_v27 = vld [vmem:[#allocation7 + $0x870] sm:$0xff]  ;;  %v4864_v42 = vld [vmem:[#allocation7 + $0xa08] sm:$0xff]  ;;  %v4866_v19 = vld [vmem:[#allocation7 + $0xb80] sm:$0xff]  ;;  %v4875_v41 = vrot.slane %v662_v51, %v3996_v23  ;;  %v284_v56 = vrot.slane %v82_v17, 4 }
  0xc7   :  { %3611 = vmatprep.subr.bf16.mxu0 %v3610_v11  ;;  %v1549_v20 = vcombine.high %v4780_v1, %v4780_v1  ;;  %v4846_v11 = vld [vmem:[#allocation7 + $0x970] sm:$0xff]  ;;  %v3654_v33 = vpack.c.bf16 %v4821_v7, %v4819_v31  ;;  %v3656_v4 = vpack.c.bf16 %v4825_v15, %v4823_v38  ;;  %v3628_v52 = vpack.c.bf16 %v4838_v53, %v4836_v27  ;;  %v113_v58 = vld [vmem:[#allocation4 + $0x1c8] sm:$0xff] }
  0xc8   :  { %3641 = vmatpush3.bf16.msra.mxu1 %v3640_v6  ;;  %v4807_v6 = vadd.f32 %v444_v59, %v443_v55  ;;  %v4834_v55 = vld [vmem:[#allocation7 + $0x8f8] sm:$0xff]  ;;  %v3658_v34 = vpack.c.bf16 %v4844_v0, %v4840_v46  ;;  %v3696_v39 = vpack.c.bf16 %v4887_v62, %v4885_v54  ;;  %v290_v31 = vrot.slane %v83_v10, 4  ;;  %v4913_v0 = vld [vmem:[#allocation7 + $0xa10] sm:$0xff] }
  0xc9   :  { %3643 = vmatprep.subr.bf16.mxu1 %v3642_v43  ;;  %2327 = vmatprep.mubr.f32.mxu1 %v1549_v20  ;;  %v461_v43 = vadd.f32 %v460_v47, %v459_v35  ;;  %v3626_v26 = vpack.c.bf16 %v4834_v55, %v4832_v36  ;;  %v3662_v20 = vpack.c.bf16 %v4858_v50, %v4856_v29  ;;  %v470_v15 = vrot.slane %v113_v58, 4  ;;  %v4909_v47 = vld [vmem:[#allocation7 + $0xa90] sm:$0xff]  ;;  %v1272_v62 = vld [vmem:[#allocation7 + $0xa38] sm:$0xff] }
  0xca   :  { %3613 = vmatpush3.bf16.msra.mxu0 %v3612_v14  ;;  %v4848_v14 = vld [vmem:[#allocation7 + $0x978] sm:$0xff]  ;;  %v797_v59 = vcombine.low %v4807_v6, %v4809_v13  ;;  %v3664_v35 = vpack.c.bf16 %v4864_v42, %v4860_v40  ;;  %v677_v6 = vcombine.low %v4872_v21, %v4875_v41  ;;  %v476_v9 = vrot.slane %v114_v22, 4  ;;  %v1315_v21 = vld [vmem:[#allocation7 + $0xb90] sm:$0xff] }
  0xcb   :  { %3615 = vmatprep.subr.bf16.mxu0 %v3614_v16  ;;  %v462_v3 = vrot.slane %v461_v43, 1  ;;  %v80_v16 = vld [vmem:[#allocation4 + $0xc0] sm:$0xff]  ;;  %v3660_v18 = vpack.c.bf16 %v4848_v14, %v4846_v11  ;;  %v285_v36 = vadd.f32 %v284_v56, %v82_v17  ;;  %v291_v55 = vadd.f32 %v290_v31, %v83_v10  ;;  %v1316_v41 = vld [vmem:[#allocation7 + $0xb98] sm:$0xff]  ;;  %v1286_v17 = vld [vmem:[#allocation7 + $0xaa8] sm:$0xff] }
  0xcc   :  { %3645 = vmatpush3.bf16.msra.mxu1 %v3644_v44  ;;  %v81_v44 = vld [vmem:[#allocation4 + $0xc8] sm:$0xff]  ;;  %v805_v45 = vrot.slane %v797_v59, %v3996_v23  ;;  %v272_v2 = vrot.slane %v80_v16, 4  ;;  %v471_v46 = vadd.f32 %v470_v15, %v113_v58  ;;  %v3666_v50 = vpack.c.bf16 %v4911_v48, %v4909_v47  ;;  %v1269_v11 = vld [vmem:[#allocation7 + $0xa20] sm:$0xff] }
  0xcd   :  { %3647 = vmatprep.subr.bf16.mxu1 %v3646_v8  ;;  %v463_v32 = vadd.f32 %v462_v3, %v461_v43  ;;  %v112_v8 = vld [vmem:[#allocation4 + $0x1c0] sm:$0xff]  ;;  %v278_v57 = vrot.slane %v81_v44, 4  ;;  %v4915_v43 = vld [vmem:[#allocation7 + $0xa18] sm:$0xff]  ;;  %v292_v29 = vrot.slane %v291_v55, 2 }
  0xce   :  { %3617 = vmatpush3.bf16.msra.mxu0 %v3616_v30  ;;  %v3694_v30 = vpack.c.bf16 %v4868_v61, %v4866_v19  ;;  %v464_v38 = vrot.slane %v112_v8, 4  ;;  %v273_v51 = vadd.f32 %v272_v2, %v80_v16  ;;  %v472_v3 = vrot.slane %v471_v46, 2  ;;  %v1317_v14 = vld [vmem:[#allocation7 + $0xba0] sm:$0xff]  ;;  %v1270_v61 = vld [vmem:[#allocation7 + $0xa28] sm:$0xff] }
  0xcf   :  { %3619 = vmatprep.subr.bf16.mxu0 %v3618_v5  ;;  %v798_v13 = vcombine.low %v457_v24, %v463_v32  ;;  %v279_v5 = vadd.f32 %v278_v57, %v81_v44  ;;  %v3668_v32 = vpack.c.bf16 %v4915_v43, %v4913_v0  ;;  %v1285_v44 = vld [vmem:[#allocation7 + $0xaa0] sm:$0xff]  ;;  %v115_v57 = vld [vmem:[#allocation4 + $0x1d8] sm:$0xff] }
  0xd0   :  { %3649 = vmatpush3.bf16.msra.mxu1 %v3648_v63  ;;  %v465_v53 = vadd.f32 %v464_v38, %v112_v8  ;;  %v477_v63 = vadd.f32 %v476_v9, %v114_v22  ;;  %v1288_v9 = vld [vmem:[#allocation7 + $0xab8] sm:$0xff] }
  0xd1   :  { %3651 = vmatprep.subr.bf16.mxu1 %v3650_v49  ;;  %v812_v7 = vrot.slane %v798_v13, %v3996_v23  ;;  %v280_v49 = vrot.slane %v279_v5, 2  ;;  %v1320_v0 = vld [vmem:[#allocation7 + $0xbb8] sm:$0xff] }
  0xd2   :  { %3621 = vmatpush3.bf16.msra.mxu0 %v3620_v12  ;;  %v274_v12 = vrot.slane %v273_v51, 2  ;;  %v466_v24 = vrot.slane %v465_v53, 2 }
  0xd3   :  { %3623 = vmatprep.subr.bf16.mxu0 %v3622_v25  ;;  %v813_v27 = vcombine.low %v805_v45, %v812_v7  ;;  %v4919_v25 = vld [vmem:[#allocation7 + $0xb10] sm:$0xff]  ;;  %v473_v45 = vadd.f32 %v472_v3, %v471_v46 }
  0xd4   :  { %3653 = vmatpush3.bf16.msra.mxu1 %v3652_v28  ;;  %v286_v28 = vrot.slane %v285_v36, 2  ;;  %v467_v8 = vadd.f32 %v466_v24, %v465_v53  ;;  %v4961_v53 = vld [vmem:[#allocation7 + $0xa30] sm:$0xff] }
  0xd5   :  { %3655 = vmatprep.subr.bf16.mxu1 %v3654_v33  ;;  %v891_v59 = vrot.slane %v813_v27, 7  ;;  %v281_v33 = vadd.f32 %v280_v49, %v279_v5  ;;  %v474_v42 = vrot.slane %v473_v45, 1  ;;  %v1302_v27 = vld [vmem:[#allocation7 + $0xb28] sm:$0xff]  ;;  %v4967_v49 = vld [vmem:[#allocation7 + $0xb38] sm:$0xff] }
  0xd6   :  { %3625 = vmatpush3.bf16.msra.mxu0 %v3624_v60  ;;  %v275_v60 = vadd.f32 %v274_v12, %v273_v51  ;;  %v287_v16 = vadd.f32 %v286_v28, %v285_v36  ;;  %v468_v15 = vrot.slane %v467_v8, 1  ;;  %v4965_v12 = vld [vmem:[#allocation7 + $0xb30] sm:$0xff]  ;;  %v1289_v28 = vld [vmem:[#allocation7 + $0xac0] sm:$0xff] }
  0xd7   :  { %3627 = vmatprep.subr.bf16.mxu0 %v3626_v26  ;;  %v293_v26 = vadd.f32 %v292_v29, %v291_v55  ;;  %v892_v10 = vsel %vm853_vm0, %v891_v59, %v677_v6  ;;  %v282_v13 = vrot.slane %v281_v33, 1  ;;  %v3670_v6 = vpack.c.bf16 %v1286_v17, %v1285_v44  ;;  %v1301_v55 = vld [vmem:[#allocation7 + $0xb20] sm:$0xff]  ;;  %v1290_v29 = vld [vmem:[#allocation7 + $0xac8] sm:$0xff]  ;;  %v4983_v17 = vld [vmem:[#allocation7 + $0xad0] sm:$0xff] }
  0xd8   :  { %3657 = vmatpush3.bf16.msra.mxu1 %v3656_v4  ;;  %v4923_v4 = vld [vmem:[#allocation7 + $0xb18] sm:$0xff]  ;;  %v893_v58 = vsel %vm855_vm1, %v891_v59, %v892_v10  ;;  %v276_v22 = vrot.slane %v275_v60, 1  ;;  %v288_v56 = vrot.slane %v287_v16, 1 }
  0xd9   :  { %3659 = vmatprep.subr.bf16.mxu1 %v3658_v34  ;;  %v478_v34 = vrot.slane %v477_v63, 2  ;;  %v894_v2 = vsel %vm857_vm2, %v891_v59, %v893_v58  ;;  %v294_v31 = vrot.slane %v293_v26, 1  ;;  %v4949_v40 = vadd.f32 %v282_v13, %v281_v33  ;;  %v1322_v33 = vld [vmem:[#allocation7 + $0xbc8] sm:$0xff]  ;;  %v1292_v10 = vld [vmem:[#allocation7 + $0xad8] sm:$0xff]  ;;  %v4990_v13 = vld [vmem:[#allocation7 + $0xbd0] sm:$0xff] }
  0xda   :  { %3629 = vmatpush3.bf16.msra.mxu0 %v3628_v52  ;;  %v3698_v52 = vpack.c.bf16 %v1316_v41, %v1315_v21  ;;  %v895_v7 = vsel %vm859_vm3, %v891_v59, %v894_v2  ;;  %v4947_v47 = vadd.f32 %v276_v22, %v275_v60  ;;  %v475_v59 = vadd.f32 %v474_v42, %v473_v45  ;;  %v4972_v41 = vld [vmem:[#allocation7 + $0xa40] sm:$0xff]  ;;  %v4992_v45 = vld [vmem:[#allocation7 + $0xbd8] sm:$0xff] }
  0xdb   :  { %3663 = vmatprep.subr.bf16.mxu0 %v3662_v20  ;;  %v3700_v20 = vpack.c.bf16 %v4923_v4, %v4919_v25  ;;  %v4942_v38 = vrot.slane %v895_v7, %v3996_v23  ;;  %v4944_v19 = vadd.f32 %v478_v34, %v477_v63  ;;  %v295_v5 = vadd.f32 %v294_v31, %v293_v26  ;;  %v4974_v25 = vld [vmem:[#allocation7 + $0xa48] sm:$0xff]  ;;  %v1321_v60 = vld [vmem:[#allocation7 + $0xbc0] sm:$0xff]  ;;  %v4987_v34 = vld [vmem:[#allocation7 + $0xa58] sm:$0xff] }
  0xdc   :  { %3661 = vmatpush3.bf16.msra.mxu1 %v3660_v18  ;;  %v1318_v18 = vld [vmem:[#allocation7 + $0xba8] sm:$0xff]  ;;  %v3672_v63 = vpack.c.bf16 %v1270_v61, %v1269_v11  ;;  %v3704_v21 = vpack.c.bf16 %v1302_v27, %v1301_v55  ;;  %v3676_v22 = vpack.c.bf16 %v1272_v62, %v4961_v53  ;;  %v3678_v2 = vpack.c.bf16 %v1290_v29, %v1289_v28  ;;  %v84_v42 = vld [vmem:[#allocation4 + $0xe0] sm:$0xff]  ;;  %v86_v55 = vld [vmem:[#allocation4 + $0xf0] sm:$0xff] }
  0xdd   :  { %2258 = vmatmul.mubr.f32.vlgmr.msra.gmra.mrb[8].mxu0 %v4757_v37  ;;  %3695 = vmatprep.subr.bf16.mxu1 %v3694_v30  ;;  %v1550_v37 = vcombine.high %v895_v7, %v895_v7  ;;  %v1287_v30 = vld [vmem:[#allocation7 + $0xab0] sm:$0xff]  ;;  %v1565_v48 = vcombine.high %v4942_v38, %v4942_v38  ;;  %v3702_v36 = vpack.c.bf16 %v1318_v18, %v1317_v14  ;;  %v480_v24 = vrot.slane %v4944_v19, 1  ;;  %v4978_v26 = vld [vmem:[#allocation7 + $0xb48] sm:$0xff]  ;;  %v5006_v14 = vld [vmem:[#allocation7 + $0xa60] sm:$0xff] }
  0xde   :  { %3665 = vmatpush3.bf16.msra.mxu0 %v3664_v35  ;;  %v482_v35 = vrot.slane %v115_v57, 4  ;;  %v3674_v54 = vpack.c.bf16 %v1288_v9, %v1287_v30  ;;  %v5000_v31 = vld [vmem:[#allocation7 + $0xae8] sm:$0xff]  ;;  %v3708_v11 = vpack.c.bf16 %v4967_v49, %v4965_v12  ;;  %v3710_v30 = vpack.c.bf16 %v1322_v33, %v1321_v60  ;;  %v87_v27 = vld [vmem:[#allocation4 + $0xf8] sm:$0xff]  ;;  %v116_v53 = vld [vmem:[#allocation4 + $0x1e0] sm:$0xff] }
  0xdf   :  { %2328 = vmatmul.mubr.f32.vlgmr.msra.gmra.mrb[8].mxu1 %v4780_v1  ;;  %3667 = vmatprep.subr.bf16.mxu0 %v3666_v50  ;;  %v4957_v51 = vrot.slane %v1550_v37, %v3996_v23  ;;  %v4959_v1 = vadd.f32 %v288_v56, %v287_v16  ;;  %v4969_v50 = vadd.f32 %v468_v15, %v467_v8  ;;  %v4976_v16 = vld [vmem:[#allocation7 + $0xb40] sm:$0xff]  ;;  %v4985_v8 = vld [vmem:[#allocation7 + $0xa50] sm:$0xff]  ;;  %v5008_v18 = vld [vmem:[#allocation7 + $0xa68] sm:$0xff]  ;;  %v296_v49 = vrot.slane %v84_v42, 4 }
  0xe0   :  { %3697 = vmatpush3.bf16.msra.mxu1 %v3696_v39  ;;  %v483_v46 = vadd.f32 %v482_v35, %v115_v57  ;;  %v1319_v39 = vld [vmem:[#allocation7 + $0xbb0] sm:$0xff]  ;;  %2397 = vmatprep.mubr.f32.mxu0 %v1565_v48  ;;  %v4996_v57 = vld [vmem:[#allocation7 + $0xb58] sm:$0xff]  ;;  %v4998_v56 = vld [vmem:[#allocation7 + $0xae0] sm:$0xff]  ;;  %v3712_v9 = vpack.c.bf16 %v4978_v26, %v4976_v16  ;;  %v3682_v48 = vpack.c.bf16 %v1292_v10, %v4983_v17 }
  0xe1   :  { %3699 = vmatprep.subr.bf16.mxu1 %v3698_v52  ;;  %v1566_v43 = vcombine.high %v4957_v51, %v4957_v51  ;;  %v679_v4 = vcombine.low %v4959_v1, %v295_v5  ;;  %v3706_v44 = vpack.c.bf16 %v1320_v0, %v1319_v39  ;;  %v4994_v52 = vld [vmem:[#allocation7 + $0xb50] sm:$0xff]  ;;  %v814_v7 = vcombine.low %v4969_v50, %v475_v59  ;;  %v5010_v37 = vld [vmem:[#allocation7 + $0xbe0] sm:$0xff]  ;;  %v85_v35 = vld [vmem:[#allocation4 + $0xe8] sm:$0xff] }
  0xe2   :  { %3669 = vmatpush3.bf16.msra.mxu0 %v3668_v32  ;;  %v484_v3 = vrot.slane %v483_v46, 2  ;;  %v678_v32 = vcombine.low %v4947_v47, %v4949_v40  ;;  %v5022_v47 = vld [vmem:[#allocation7 + $0xbe8] sm:$0xff]  ;;  %v3684_v1 = vpack.c.bf16 %v4987_v34, %v4985_v8  ;;  %v3714_v5 = vpack.c.bf16 %v4992_v45, %v4990_v13  ;;  %v118_v0 = vld [vmem:[#allocation4 + $0x1f0] sm:$0xff]  ;;  %v1296_v33 = vld [vmem:[#allocation7 + $0xaf8] sm:$0xff] }
  0xe3   :  { %3671 = vmatprep.subr.bf16.mxu0 %v3670_v6  ;;  %2467 = vmatprep.mubr.f32.mxu1 %v1566_v43  ;;  %v5016_v61 = vrot.slane %v679_v4, %v3996_v23  ;;  %v822_v62 = vrot.slane %v814_v7, %v3996_v23  ;;  %v117_v39 = vld [vmem:[#allocation4 + $0x1e8] sm:$0xff]  ;;  %v3718_v43 = vpack.c.bf16 %v5022_v47, %v5010_v37  ;;  %v302_v28 = vrot.slane %v85_v35, 4  ;;  %v1295_v60 = vld [vmem:[#allocation7 + $0xaf0] sm:$0xff]  ;;  %v1280_v13 = vld [vmem:[#allocation7 + $0xa78] sm:$0xff] }
  0xe4   :  { %3701 = vmatpush3.bf16.msra.mxu1 %v3700_v20  ;;  %v485_v58 = vadd.f32 %v484_v3, %v483_v46  ;;  %v481_v20 = vadd.f32 %v480_v24, %v4944_v19  ;;  %v5013_v15 = vrot.slane %v678_v32, %v3996_v23  ;;  %v3680_v19 = vpack.c.bf16 %v4974_v25, %v4972_v41  ;;  %v1310_v17 = vld [vmem:[#allocation7 + $0xb68] sm:$0xff]  ;;  %v5041_v10 = vld [vmem:[#allocation7 + $0xa70] sm:$0xff] }
  0xe5   :  { %3703 = vmatprep.subr.bf16.mxu1 %v3702_v36  ;;  %v3716_v36 = vpack.c.bf16 %v4996_v57, %v4994_v52  ;;  %v3686_v46 = vpack.c.bf16 %v5000_v31, %v4998_v56  ;;  %v308_v50 = vrot.slane %v86_v55, 4  ;;  %v314_v59 = vrot.slane %v87_v27, 4  ;;  %v1327_v45 = vld [vmem:[#allocation7 + $0xbf0] sm:$0xff]  ;;  %v1346_v7 = vld [vmem:[#allocation7 + $0xc88] sm:$0xff] }
  0xe6   :  { %3673 = vmatpush3.bf16.msra.mxu0 %v3672_v63  ;;  %v486_v6 = vrot.slane %v485_v58, 1  ;;  %v3688_v63 = vpack.c.bf16 %v5008_v18, %v5006_v14  ;;  %v694_v12 = vcombine.low %v5013_v15, %v5016_v61  ;;  %v488_v24 = vrot.slane %v116_v53, 4 }
  0xe7   :  { %3675 = vmatprep.subr.bf16.mxu0 %v3674_v54  ;;  %v297_v3 = vadd.f32 %v296_v49, %v84_v42  ;;  %v494_v41 = vrot.slane %v117_v39, 4  ;;  %v500_v25 = vrot.slane %v118_v0, 4  ;;  %v309_v26 = vadd.f32 %v308_v50, %v86_v55  ;;  %v1312_v42 = vld [vmem:[#allocation7 + $0xb78] sm:$0xff]  ;;  %v1347_v50 = vld [vmem:[#allocation7 + $0xc90] sm:$0xff] }
  0xe8   :  { %3705 = vmatpush3.bf16.msra.mxu1 %v3704_v21  ;;  %v487_v40 = vadd.f32 %v486_v6, %v485_v58  ;;  %v303_v21 = vadd.f32 %v302_v28, %v85_v35  ;;  %v315_v32 = vadd.f32 %v314_v59, %v87_v27  ;;  %v489_v4 = vadd.f32 %v488_v24, %v116_v53  ;;  %v1345_v6 = vld [vmem:[#allocation7 + $0xc80] sm:$0xff]  ;;  %v1348_v59 = vld [vmem:[#allocation7 + $0xc98] sm:$0xff] }
  0xe9   :  { %3707 = vmatprep.subr.bf16.mxu1 %v3706_v44  ;;  %v1309_v44 = vld [vmem:[#allocation7 + $0xb60] sm:$0xff]  ;;  %v298_v8 = vrot.slane %v297_v3, 2  ;;  %v495_v58 = vadd.f32 %v494_v41, %v117_v39  ;;  %v3690_v31 = vpack.c.bf16 %v1296_v33, %v1295_v60  ;;  %v3692_v55 = vpack.c.bf16 %v1280_v13, %v5041_v10  ;;  %v119_v39 = vld [vmem:[#allocation4 + $0x1f8] sm:$0xff] }
  0xea   :  { %3677 = vmatpush3.bf16.msra.mxu0 %v3676_v22  ;;  %v815_v54 = vcombine.low %v481_v20, %v487_v40  ;;  %v304_v34 = vrot.slane %v303_v21, 2  ;;  %v501_v22 = vadd.f32 %v500_v25, %v118_v0  ;;  %v316_v57 = vrot.slane %v315_v32, 2  ;;  %v1328_v20 = vld [vmem:[#allocation7 + $0xbf8] sm:$0xff]  ;;  %v1311_v40 = vld [vmem:[#allocation7 + $0xb70] sm:$0xff]  ;;  %v5044_v35 = vld [vmem:[#allocation7 + $0xc00] sm:$0xff] }
  0xeb   :  { %3679 = vmatprep.subr.bf16.mxu0 %v3678_v2  ;;  %v310_v2 = vrot.slane %v309_v26, 2  ;;  %v490_v56 = vrot.slane %v489_v4, 2  ;;  %v496_v15 = vrot.slane %v495_v58, 2  ;;  %v3720_v47 = vpack.c.bf16 %v1310_v17, %v1309_v44  ;;  %v5052_v0 = vld [vmem:[#allocation7 + $0xd00] sm:$0xff]  ;;  %v1380_v44 = vld [vmem:[#allocation7 + $0xd98] sm:$0xff] }
  0xec   :  { %3709 = vmatpush3.bf16.msra.mxu1 %v3708_v11  ;;  %v829_v29 = vrot.slane %v815_v54, %v3996_v23  ;;  %v299_v11 = vadd.f32 %v298_v8, %v297_v3  ;;  %v305_v37 = vadd.f32 %v304_v34, %v303_v21  ;;  %v3722_v27 = vpack.c.bf16 %v1328_v20, %v1327_v45  ;;  %v1377_v54 = vld [vmem:[#allocation7 + $0xd80] sm:$0xff]  ;;  %v1331_v34 = vld [vmem:[#allocation7 + $0xc10] sm:$0xff] }
  0xed   :  { %3711 = vmatprep.subr.bf16.mxu1 %v3710_v30  ;;  %v317_v30 = vadd.f32 %v316_v57, %v315_v32  ;;  %v3726_v53 = vpack.c.bf16 %v1346_v7, %v1345_v6  ;;  %v3724_v14 = vpack.c.bf16 %v1312_v42, %v1311_v40  ;;  %v506_v25 = vrot.slane %v119_v39, 4  ;;  %v1364_v57 = vld [vmem:[#allocation7 + $0xd18] sm:$0xff]  ;;  %v1333_v40 = vld [vmem:[#allocation7 + $0xc20] sm:$0xff]  ;;  %v1334_v42 = vld [vmem:[#allocation7 + $0xc28] sm:$0xff] }
  0xee   :  { %3681 = vmatpush3.bf16.msra.mxu0 %v3680_v19  ;;  %v830_v16 = vcombine.low %v822_v62, %v829_v29  ;;  %v311_v19 = vadd.f32 %v310_v2, %v309_v26  ;;  %v306_v28 = vrot.slane %v305_v37, 1  ;;  %v3730_v32 = vpack.c.bf16 %v1348_v59, %v1347_v50 }
  0xef   :  { %3683 = vmatprep.subr.bf16.mxu0 %v3682_v48  ;;  %v318_v21 = vrot.slane %v317_v30, 1  ;;  %v507_v8 = vadd.f32 %v506_v25, %v119_v39  ;;  %v1384_v39 = vld [vmem:[#allocation7 + $0xdb8] sm:$0xff]  ;;  %v1385_v25 = vld [vmem:[#allocation7 + $0xdc0] sm:$0xff] }
  0xf0   :  { %3713 = vmatpush3.bf16.msra.mxu1 %v3712_v9  ;;  %v898_v52 = vrot.slane %v830_v16, 7  ;;  %v491_v9 = vadd.f32 %v490_v56, %v489_v4  ;;  %v312_v29 = vrot.slane %v311_v19, 1  ;;  %v1379_v4 = vld [vmem:[#allocation7 + $0xd90] sm:$0xff]  ;;  %v307_v13 = vadd.f32 %v306_v28, %v305_v37  ;;  %v1349_v56 = vld [vmem:[#allocation7 + $0xca0] sm:$0xff] }
  0xf1   :  { %3715 = vmatprep.subr.bf16.mxu1 %v3714_v5  ;;  %v502_v5 = vrot.slane %v501_v22, 2  ;;  %v1381_v37 = vld [vmem:[#allocation7 + $0xda0] sm:$0xff] }
  0xf2   :  { %3685 = vmatpush3.bf16.msra.mxu0 %v3684_v1  ;;  %v899_v61 = vsel %vm853_vm0, %v898_v52, %v694_v12  ;;  %v497_v1 = vadd.f32 %v496_v15, %v495_v58  ;;  %v1362_v12 = vld [vmem:[#allocation7 + $0xd08] sm:$0xff]  ;;  %v492_v41 = vrot.slane %v491_v9, 1  ;;  %v1332_v58 = vld [vmem:[#allocation7 + $0xc18] sm:$0xff]  ;;  %v313_v45 = vadd.f32 %v312_v29, %v311_v19  ;;  %v1353_v28 = vld [vmem:[#allocation7 + $0xcc0] sm:$0xff] }
  0xf3   :  { %3687 = vmatprep.subr.bf16.mxu0 %v3686_v46  ;;  %v900_v48 = vsel %vm855_vm1, %v898_v52, %v899_v61  ;;  %v1330_v46 = vld [vmem:[#allocation7 + $0xc08] sm:$0xff]  ;;  %v3760_v16 = vpack.c.bf16 %v1362_v12, %v5052_v0  ;;  %v508_v15 = vrot.slane %v507_v8, 2  ;;  %v3732_v61 = vpack.c.bf16 %v1332_v58, %v1331_v34 }
  0xf4   :  { %3717 = vmatpush3.bf16.msra.mxu1 %v3716_v36  ;;  %v901_v62 = vsel %vm857_vm2, %v898_v52, %v900_v48  ;;  %v1378_v36 = vld [vmem:[#allocation7 + $0xd88] sm:$0xff]  ;;  %v498_v18 = vrot.slane %v497_v1, 1  ;;  %v3728_v60 = vpack.c.bf16 %v1330_v46, %v5044_v35  ;;  %v493_v2 = vadd.f32 %v492_v41, %v491_v9  ;;  %v1365_v35 = vld [vmem:[#allocation7 + $0xd20] sm:$0xff] }
  0xf5   :  { %3719 = vmatprep.subr.bf16.mxu1 %v3718_v43  ;;  %v902_v49 = vsel %vm859_vm3, %v898_v52, %v901_v62  ;;  %v300_v43 = vrot.slane %v299_v11, 1  ;;  %v3758_v33 = vpack.c.bf16 %v1378_v36, %v1377_v54  ;;  %v319_v52 = vadd.f32 %v318_v21, %v317_v30  ;;  %v1382_v19 = vld [vmem:[#allocation7 + $0xda8] sm:$0xff]  ;;  %v1383_v62 = vld [vmem:[#allocation7 + $0xdb0] sm:$0xff] }
  0xf6   :  { %3689 = vmatpush3.bf16.msra.mxu0 %v3688_v63  ;;  %v5056_v24 = vrot.slane %v902_v49, %v3996_v23  ;;  %v1567_v3 = vcombine.high %v902_v49, %v902_v49  ;;  %v503_v63 = vadd.f32 %v502_v5, %v501_v22  ;;  %v1363_v22 = vld [vmem:[#allocation7 + $0xd10] sm:$0xff]  ;;  %v499_v6 = vadd.f32 %v498_v18, %v497_v1  ;;  %v1366_v1 = vld [vmem:[#allocation7 + $0xd28] sm:$0xff]  ;;  %v1352_v5 = vld [vmem:[#allocation7 + $0xcb8] sm:$0xff] }
  0xf7   :  { %3691 = vmatprep.subr.bf16.mxu0 %v3690_v31  ;;  %v301_v10 = vadd.f32 %v300_v43, %v299_v11  ;;  %v1350_v31 = vld [vmem:[#allocation7 + $0xca8] sm:$0xff]  ;;  %v3762_v11 = vpack.c.bf16 %v1380_v44, %v1379_v4  ;;  %v509_v30 = vadd.f32 %v508_v15, %v507_v8  ;;  %v3764_v9 = vpack.c.bf16 %v1364_v57, %v1363_v22  ;;  %v1335_v49 = vld [vmem:[#allocation7 + $0xc30] sm:$0xff]  ;;  %v1336_v43 = vld [vmem:[#allocation7 + $0xc38] sm:$0xff] }
  0xf8   :  { %3721 = vmatpush3.bf16.msra.mxu1 %v3720_v47  ;;  %v5061_v26 = vrot.slane %v1567_v3, %v3996_v23  ;;  %v1582_v17 = vcombine.high %v5056_v24, %v5056_v24  ;;  %v504_v7 = vrot.slane %v503_v63, 1  ;;  %v3734_v47 = vpack.c.bf16 %v1350_v31, %v1349_v56  ;;  %v1354_v29 = vld [vmem:[#allocation7 + $0xcc8] sm:$0xff]  ;;  %v1368_v18 = vld [vmem:[#allocation7 + $0xd38] sm:$0xff]  ;;  %v1369_v22 = vld [vmem:[#allocation7 + $0xd40] sm:$0xff] }
  0xf9   :  { %3723 = vmatprep.subr.bf16.mxu1 %v3722_v27  ;;  %v695_v48 = vcombine.low %v301_v10, %v307_v13  ;;  %v510_v27 = vrot.slane %v509_v30, 1  ;;  %v831_v46 = vcombine.low %v493_v2, %v499_v6  ;;  %v3766_v54 = vpack.c.bf16 %v1382_v19, %v1381_v37  ;;  %v1338_v4 = vld [vmem:[#allocation7 + $0xc48] sm:$0xff]  ;;  %v1356_v10 = vld [vmem:[#allocation7 + $0xcd8] sm:$0xff]  ;;  %v1339_v31 = vld [vmem:[#allocation7 + $0xc50] sm:$0xff] }
  0xfa   :  { %3693 = vmatpush3.bf16.msra.mxu0 %v3692_v55  ;;  %v1583_v20 = vcombine.high %v5061_v26, %v5061_v26  ;;  %v505_v55 = vadd.f32 %v504_v7, %v503_v63  ;;  %v3768_v0 = vpack.c.bf16 %v1366_v1, %v1365_v35  ;;  %v3770_v41 = vpack.c.bf16 %v1384_v39, %v1383_v62  ;;  %v1370_v13 = vld [vmem:[#allocation7 + $0xd48] sm:$0xff]  ;;  %v1388_v2 = vld [vmem:[#allocation7 + $0xdd8] sm:$0xff]  ;;  %v1357_v7 = vld [vmem:[#allocation7 + $0xce0] sm:$0xff] }
  0xfb   :  { %3727 = vmatprep.subr.bf16.mxu0 %v3726_v53  ;;  %v696_v53 = vcombine.low %v313_v45, %v319_v52  ;;  %v511_v36 = vadd.f32 %v510_v27, %v509_v30  ;;  %v703_v50 = vrot.slane %v695_v48, %v3996_v23  ;;  %v839_v21 = vrot.slane %v831_v46, %v3996_v23  ;;  %v1387_v52 = vld [vmem:[#allocation7 + $0xdd0] sm:$0xff]  ;;  %v1358_v15 = vld [vmem:[#allocation7 + $0xce8] sm:$0xff]  ;;  %v1372_v19 = vld [vmem:[#allocation7 + $0xd58] sm:$0xff] }
  0xfc   :  { %3725 = vmatpush3.bf16.msra.mxu1 %v3724_v14  ;;  %v1367_v14 = vld [vmem:[#allocation7 + $0xd30] sm:$0xff]  ;;  %v3740_v63 = vpack.c.bf16 %v1336_v43, %v1335_v49  ;;  %v3776_v6 = vpack.c.bf16 %v1370_v13, %v1369_v22  ;;  %v3750_v35 = vpack.c.bf16 %v1358_v15, %v1357_v7  ;;  %v1341_v48 = vld [vmem:[#allocation7 + $0xc60] sm:$0xff]  ;;  %v1342_v1 = vld [vmem:[#allocation7 + $0xc68] sm:$0xff] }
  0xfd   :  { %2398 = vmatmul.mubr.f32.vlgmr.msra.gmra.mrb[10].mxu0 %v4942_v38  ;;  %3759 = vmatprep.subr.bf16.mxu1 %v3758_v33  ;;  %v1351_v38 = vld [vmem:[#allocation7 + $0xcb0] sm:$0xff]  ;;  %v710_v59 = vrot.slane %v696_v53, %v3996_v23  ;;  %v832_v3 = vcombine.low %v505_v55, %v511_v36  ;;  %v3772_v44 = vpack.c.bf16 %v1368_v18, %v1367_v14  ;;  %v1360_v55 = vld [vmem:[#allocation7 + $0xcf8] sm:$0xff]  ;;  %v1373_v53 = vld [vmem:[#allocation7 + $0xd60] sm:$0xff] }
  0xfe   :  { %3729 = vmatpush3.bf16.msra.mxu0 %v3728_v60  ;;  %2537 = vmatprep.mubr.f32.mxu0 %v1582_v17  ;;  %v3738_v12 = vpack.c.bf16 %v1352_v5, %v1351_v38  ;;  %v1386_v60 = vld [vmem:[#allocation7 + $0xdc8] sm:$0xff]  ;;  %v1355_v17 = vld [vmem:[#allocation7 + $0xcd0] sm:$0xff]  ;;  %v1392_v39 = vld [vmem:[#allocation7 + $0xdf8] sm:$0xff] }
  0xff   :  { %2468 = vmatmul.mubr.f32.vlgmr.msra.gmra.mrb[10].mxu1 %v4957_v51  ;;  %3731 = vmatprep.subr.bf16.mxu0 %v3730_v32  ;;  %v3736_v51 = vpack.c.bf16 %v1334_v42, %v1333_v40  ;;  %v846_v33 = vrot.slane %v832_v3, %v3996_v23  ;;  %v1337_v32 = vld [vmem:[#allocation7 + $0xc40] sm:$0xff]  ;;  %v711_v8 = vcombine.low %v703_v50, %v710_v59  ;;  %v1371_v37 = vld [vmem:[#allocation7 + $0xd50] sm:$0xff]  ;;  %v1390_v40 = vld [vmem:[#allocation7 + $0xde8] sm:$0xff] }
 0x100   :  { %3761 = vmatpush3.bf16.msra.mxu1 %v3760_v16  ;;  %2607 = vmatprep.mubr.f32.mxu1 %v1583_v20  ;;  %v3742_v16 = vpack.c.bf16 %v1354_v29, %v1353_v28  ;;  %v3774_v58 = vpack.c.bf16 %v1386_v60, %v1385_v25  ;;  %v3744_v45 = vpack.c.bf16 %v1338_v4, %v1337_v32  ;;  %v1340_v20 = vld [vmem:[#allocation7 + $0xc58] sm:$0xff]  ;;  %v1359_v5 = vld [vmem:[#allocation7 + $0xcf0] sm:$0xff]  ;;  %v1374_v46 = vld [vmem:[#allocation7 + $0xd68] sm:$0xff] }
 0x101   :  { %3763 = vmatprep.subr.bf16.mxu1 %v3762_v11  ;;  %v847_v34 = vcombine.low %v839_v21, %v846_v33  ;;  %v3746_v56 = vpack.c.bf16 %v1356_v10, %v1355_v17  ;;  %v3780_v38 = vpack.c.bf16 %v1372_v19, %v1371_v37  ;;  %v1391_v62 = vld [vmem:[#allocation7 + $0xdf0] sm:$0xff]  ;;  %v3754_v36 = vpack.c.bf16 %v1360_v55, %v1359_v5  ;;  %v1409_v43 = vld [vmem:[#allocation7 + $0xe80] sm:$0xff]  ;;  %v1410_v28 = vld [vmem:[#allocation7 + $0xe88] sm:$0xff] }
 0x102   :  { %3733 = vmatpush3.bf16.msra.mxu0 %v3732_v61  ;;  %v3778_v61 = vpack.c.bf16 %v1388_v2, %v1387_v52  ;;  %v3784_v49 = vpack.c.bf16 %v1374_v46, %v1373_v53  ;;  %v3786_v50 = vpack.c.bf16 %v1392_v39, %v1391_v62  ;;  %v1375_v59 = vld [vmem:[#allocation7 + $0xd70] sm:$0xff]  ;;  %v1376_v3 = vld [vmem:[#allocation7 + $0xd78] sm:$0xff]  ;;  %v1442_v14 = vld [vmem:[#allocation7 + $0xf88] sm:$0xff] }
 0x103   :  { %3735 = vmatprep.subr.bf16.mxu0 %v3734_v47  ;;  %v905_v57 = vrot.slane %v847_v34, 7  ;;  %v1389_v47 = vld [vmem:[#allocation7 + $0xde0] sm:$0xff]  ;;  %v1394_v60 = vld [vmem:[#allocation7 + $0xe08] sm:$0xff]  ;;  %v3788_v33 = vpack.c.bf16 %v1376_v3, %v1375_v59  ;;  %v1412_v32 = vld [vmem:[#allocation7 + $0xe98] sm:$0xff] }
 0x104   :  { %3765 = vmatpush3.bf16.msra.mxu1 %v3764_v9  ;;  %v3748_v9 = vpack.c.bf16 %v1340_v20, %v1339_v31  ;;  %v3782_v27 = vpack.c.bf16 %v1390_v40, %v1389_v47  ;;  %v1393_v25 = vld [vmem:[#allocation7 + $0xe00] sm:$0xff]  ;;  %v1426_v10 = vld [vmem:[#allocation7 + $0xf08] sm:$0xff]  ;;  %v1443_v34 = vld [vmem:[#allocation7 + $0xf90] sm:$0xff] }
 0x105   :  { %3767 = vmatprep.subr.bf16.mxu1 %v3766_v54  ;;  %v906_v11 = vsel %vm853_vm0, %v905_v57, %v711_v8  ;;  %v1425_v17 = vld [vmem:[#allocation7 + $0xf00] sm:$0xff]  ;;  %v3792_v8 = vpack.c.bf16 %v1394_v60, %v1393_v25  ;;  %v1396_v52 = vld [vmem:[#allocation7 + $0xe18] sm:$0xff]  ;;  %v1427_v20 = vld [vmem:[#allocation7 + $0xf10] sm:$0xff] }
 0x106   :  { %3737 = vmatpush3.bf16.msra.mxu0 %v3736_v51  ;;  %v907_v30 = vsel %vm855_vm1, %v905_v57, %v906_v11  ;;  %v3752_v51 = vpack.c.bf16 %v1342_v1, %v1341_v48  ;;  %v3824_v2 = vpack.c.bf16 %v1426_v10, %v1425_v17  ;;  %v1445_v15 = vld [vmem:[#allocation7 + $0xfa0] sm:$0xff]  ;;  %v1446_v11 = vld [vmem:[#allocation7 + $0xfa8] sm:$0xff]  ;;  %v1416_v47 = vld [vmem:[#allocation7 + $0xeb8] sm:$0xff] }
 0x107   :  { %3739 = vmatprep.subr.bf16.mxu0 %v3738_v12  ;;  %v908_v42 = vsel %vm857_vm2, %v905_v57, %v907_v30  ;;  %v1344_v12 = vld [vmem:[#allocation7 + $0xc78] sm:$0xff]  ;;  %v1397_v37 = vld [vmem:[#allocation7 + $0xe20] sm:$0xff]  ;;  %v1398_v19 = vld [vmem:[#allocation7 + $0xe28] sm:$0xff] }
 0x108   :  { %3769 = vmatpush3.bf16.msra.mxu1 %v3768_v0  ;;  %v909_v54 = vsel %vm859_vm3, %v905_v57, %v908_v42  ;;  %v1343_v0 = vld [vmem:[#allocation7 + $0xc70] sm:$0xff]  ;;  %v1413_v57 = vld [vmem:[#allocation7 + $0xea0] sm:$0xff]  ;;  %v1430_v42 = vld [vmem:[#allocation7 + $0xf28] sm:$0xff] }
 0x109   :  { %3771 = vmatprep.subr.bf16.mxu1 %v3770_v41  ;;  %v1584_v29 = vcombine.high %v909_v54, %v909_v54  ;;  %v3756_v21 = vpack.c.bf16 %v1344_v12, %v1343_v0  ;;  %v1441_v41 = vld [vmem:[#allocation7 + $0xf80] sm:$0xff]  ;;  %v5078_v18 = vrot.slane %v909_v54, %v3996_v23  ;;  %v1447_v48 = vld [vmem:[#allocation7 + $0xfb0] sm:$0xff]  ;;  %v1448_v1 = vld [vmem:[#allocation7 + $0xfb8] sm:$0xff] }
 0x10a   :  { %3741 = vmatpush3.bf16.msra.mxu0 %v3740_v63  ;;  %v3790_v63 = vpack.c.bf16 %v1410_v28, %v1409_v43  ;;  %v1429_v40 = vld [vmem:[#allocation7 + $0xf20] sm:$0xff]  ;;  %v1400_v5 = vld [vmem:[#allocation7 + $0xe38] sm:$0xff]  ;;  %v1418_v53 = vld [vmem:[#allocation7 + $0xec8] sm:$0xff]  ;;  %v3834_v46 = vpack.c.bf16 %v1448_v1, %v1447_v48 }
 0x10b   :  { %3743 = vmatprep.subr.bf16.mxu0 %v3742_v16  ;;  %v1411_v16 = vld [vmem:[#allocation7 + $0xe90] sm:$0xff]  ;;  %v5081_v4 = vrot.slane %v1584_v29, %v3996_v23  ;;  %v1599_v22 = vcombine.high %v5078_v18, %v5078_v18  ;;  %v1414_v23 = vld [vmem:[#allocation7 + $0xea8] sm:$0xff]  ;;  %v3832_v55 = vpack.c.bf16 %v1430_v42, %v1429_v40  ;;  %v1449_v39 = vld [vmem:[#allocation7 + $0xfc0] sm:$0xff] }
 0x10c   :  { %3773 = vmatpush3.bf16.msra.mxu1 %v3772_v44  ;;  %v3822_v44 = vpack.c.bf16 %v1442_v14, %v1441_v41  ;;  %v3794_v13 = vpack.c.bf16 %v1412_v32, %v1411_v16  ;;  %v1431_v54 = vld [vmem:[#allocation7 + $0xf30] sm:$0xff]  ;;  %v1401_v12 = vld [vmem:[#allocation7 + $0xe40] sm:$0xff]  ;;  %v1420_v29 = vld [vmem:[#allocation7 + $0xed8] sm:$0xff] }
 0x10d   :  { %3775 = vmatprep.subr.bf16.mxu1 %v3774_v58  ;;  %v1444_v58 = vld [vmem:[#allocation7 + $0xf98] sm:$0xff]  ;;  %v1419_v28 = vld [vmem:[#allocation7 + $0xed0] sm:$0xff]  ;;  %v1433_v59 = vld [vmem:[#allocation7 + $0xf40] sm:$0xff] }
 0x10e   :  { %3745 = vmatpush3.bf16.msra.mxu0 %v3744_v45  ;;  %v1395_v45 = vld [vmem:[#allocation7 + $0xe10] sm:$0xff]  ;;  %v3826_v31 = vpack.c.bf16 %v1444_v58, %v1443_v34  ;;  %v1434_v3 = vld [vmem:[#allocation7 + $0xf48] sm:$0xff]  ;;  %v1452_v14 = vld [vmem:[#allocation7 + $0xfd8] sm:$0xff] }
 0x10f   :  { %3747 = vmatprep.subr.bf16.mxu0 %v3746_v56  ;;  %v1600_v56 = vcombine.high %v5081_v4, %v5081_v4  ;;  %v3796_v7 = vpack.c.bf16 %v1396_v52, %v1395_v45  ;;  %v1451_v41 = vld [vmem:[#allocation7 + $0xfd0] sm:$0xff]  ;;  %v1404_v60 = vld [vmem:[#allocation7 + $0xe58] sm:$0xff]  ;;  %v1421_v16 = vld [vmem:[#allocation7 + $0xee0] sm:$0xff] }
 0x110   :  { %3777 = vmatpush3.bf16.msra.mxu1 %v3776_v6  ;;  %v1428_v6 = vld [vmem:[#allocation7 + $0xf18] sm:$0xff]  ;;  %v1403_v25 = vld [vmem:[#allocation7 + $0xe50] sm:$0xff]  ;;  %v1422_v32 = vld [vmem:[#allocation7 + $0xee8] sm:$0xff] }
 0x111   :  { %3779 = vmatprep.subr.bf16.mxu1 %v3778_v61  ;;  %v3798_v61 = vpack.c.bf16 %v1414_v23, %v1413_v57  ;;  %v3828_v30 = vpack.c.bf16 %v1428_v6, %v1427_v20  ;;  %v1435_v17 = vld [vmem:[#allocation7 + $0xf50] sm:$0xff]  ;;  %v1436_v10 = vld [vmem:[#allocation7 + $0xf58] sm:$0xff]  ;;  %v1453_v34 = vld [vmem:[#allocation7 + $0xfe0] sm:$0xff] }
 0x112   :  { %3749 = vmatpush3.bf16.msra.mxu0 %v3748_v9  ;;  %v1415_v9 = vld [vmem:[#allocation7 + $0xeb0] sm:$0xff]  ;;  %v1454_v58 = vld [vmem:[#allocation7 + $0xfe8] sm:$0xff]  ;;  %v1424_v23 = vld [vmem:[#allocation7 + $0xef8] sm:$0xff] }
 0x113   :  { %3751 = vmatprep.subr.bf16.mxu0 %v3750_v35  ;;  %v3800_v35 = vpack.c.bf16 %v1398_v19, %v1397_v37  ;;  %v1406_v45 = vld [vmem:[#allocation7 + $0xe68] sm:$0xff]  ;;  %v1423_v57 = vld [vmem:[#allocation7 + $0xef0] sm:$0xff]  ;;  %v1437_v20 = vld [vmem:[#allocation7 + $0xf60] sm:$0xff] }
 0x114   :  { %3781 = vmatpush3.bf16.msra.mxu1 %v3780_v38  ;;  %v3802_v38 = vpack.c.bf16 %v1416_v47, %v1415_v9  ;;  %v1438_v6 = vld [vmem:[#allocation7 + $0xf68] sm:$0xff]  ;;  %v1456_v37 = vld [vmem:[#allocation7 + $0xff8] sm:$0xff]  ;;  %v1407_v9 = vld [vmem:[#allocation7 + $0xe70] sm:$0xff] }
 0x115   :  { %3783 = vmatprep.subr.bf16.mxu1 %v3782_v27  ;;  %v1417_v27 = vld [vmem:[#allocation7 + $0xec0] sm:$0xff]  ;;  %v1408_v47 = vld [vmem:[#allocation7 + $0xe78] sm:$0xff]  ;;  %v3848_v40 = vpack.c.bf16 %v1438_v6, %v1437_v20 }
 0x116   :  { %3753 = vmatpush3.bf16.msra.mxu0 %v3752_v51  ;;  %v1432_v51 = vld [vmem:[#allocation7 + $0xf38] sm:$0xff]  ;;  %v3806_v0 = vpack.c.bf16 %v1418_v53, %v1417_v27 }
 0x117   :  { %3755 = vmatprep.subr.bf16.mxu0 %v3754_v36  ;;  %v1450_v36 = vld [vmem:[#allocation7 + $0xfc8] sm:$0xff]  ;;  %v3836_v43 = vpack.c.bf16 %v1432_v51, %v1431_v54  ;;  %v1440_v48 = vld [vmem:[#allocation7 + $0xf78] sm:$0xff] }
 0x118   :  { %3785 = vmatpush3.bf16.msra.mxu1 %v3784_v49  ;;  %v1402_v49 = vld [vmem:[#allocation7 + $0xe48] sm:$0xff] }
 0x119   :  { %3787 = vmatprep.subr.bf16.mxu1 %v3786_v50  ;;  %v3838_v50 = vpack.c.bf16 %v1450_v36, %v1449_v39 }
 0x11a   :  { %3757 = vmatpush3.bf16.msra.mxu0 %v3756_v21  ;;  %v3808_v21 = vpack.c.bf16 %v1402_v49, %v1401_v12 }
 0x11b   :  { %3791 = vmatprep.subr.bf16.mxu0 %v3790_v63  ;;  %v3810_v63 = vpack.c.bf16 %v1420_v29, %v1419_v28 }
 0x11c   :  { %3789 = vmatpush3.bf16.msra.mxu1 %v3788_v33  ;;  %v3840_v33 = vpack.c.bf16 %v1434_v3, %v1433_v59 }
 0x11d   :  { %2538 = vmatmul.mubr.f32.vlgmr.msra.gmra.mrb[12].mxu0 %v5056_v24  ;;  %3823 = vmatprep.subr.bf16.mxu1 %v3822_v44  ;;  %v3830_v24 = vpack.c.bf16 %v1446_v11, %v1445_v15  ;;  %v3842_v44 = vpack.c.bf16 %v1452_v14, %v1451_v41 }
 0x11e   :  { %3793 = vmatpush3.bf16.msra.mxu0 %v3792_v8  ;;  %2677 = vmatprep.mubr.f32.mxu0 %v1599_v22  ;;  %v3812_v8 = vpack.c.bf16 %v1404_v60, %v1403_v25  ;;  %v3814_v22 = vpack.c.bf16 %v1422_v32, %v1421_v16 }
 0x11f   :  { %2608 = vmatmul.mubr.f32.vlgmr.msra.gmra.mrb[12].mxu1 %v5061_v26  ;;  %3795 = vmatprep.subr.bf16.mxu0 %v3794_v13  ;;  %v1399_v26 = vld [vmem:[#allocation7 + $0xe30] sm:$0xff]  ;;  %v1405_v13 = vld [vmem:[#allocation7 + $0xe60] sm:$0xff] }
 0x120   :  { %3825 = vmatpush3.bf16.msra.mxu1 %v3824_v2  ;;  %2747 = vmatprep.mubr.f32.mxu1 %v1600_v56  ;;  %v3804_v62 = vpack.c.bf16 %v1400_v5, %v1399_v26  ;;  %v3844_v2 = vpack.c.bf16 %v1436_v10, %v1435_v17  ;;  %v3816_v11 = vpack.c.bf16 %v1406_v45, %v1405_v13 }
 0x121   :  { %3827 = vmatprep.subr.bf16.mxu1 %v3826_v31  ;;  %v3846_v31 = vpack.c.bf16 %v1454_v58, %v1453_v34 }
 0x122   :  { %3797 = vmatpush3.bf16.msra.mxu0 %v3796_v7 }
 0x123   :  { %3799 = vmatprep.subr.bf16.mxu0 %v3798_v61  ;;  %v1455_v61 = vld [vmem:[#allocation7 + $0xff0] sm:$0xff] }
 0x124   :  { %3829 = vmatpush3.bf16.msra.mxu1 %v3828_v30  ;;  %v3818_v30 = vpack.c.bf16 %v1424_v23, %v1423_v57  ;;  %v3850_v42 = vpack.c.bf16 %v1456_v37, %v1455_v61 }
 0x125   :  { %3831 = vmatprep.subr.bf16.mxu1 %v3830_v24 }
 0x126   :  { %3801 = vmatpush3.bf16.msra.mxu0 %v3800_v35  ;;  %v1439_v35 = vld [vmem:[#allocation7 + $0xf70] sm:$0xff] }
 0x127   :  { %3803 = vmatprep.subr.bf16.mxu0 %v3802_v38  ;;  %v3820_v38 = vpack.c.bf16 %v1408_v47, %v1407_v9  ;;  %v3852_v26 = vpack.c.bf16 %v1440_v48, %v1439_v35 }
 0x128   :  { %3833 = vmatpush3.bf16.msra.mxu1 %v3832_v55 }
 0x129   :  { %3835 = vmatprep.subr.bf16.mxu1 %v3834_v46 }
 0x12a   :  { %3805 = vmatpush3.bf16.msra.mxu0 %v3804_v62 }
 0x12b   :  { %3807 = vmatprep.subr.bf16.mxu0 %v3806_v0 }
 0x12c   :  { %3837 = vmatpush3.bf16.msra.mxu1 %v3836_v43 }
 0x12d   :  { %3839 = vmatprep.subr.bf16.mxu1 %v3838_v50 }
 0x12e   :  { %3809 = vmatpush3.bf16.msra.mxu0 %v3808_v21 }
 0x12f   :  { %3811 = vmatprep.subr.bf16.mxu0 %v3810_v63 }
 0x130   :  { %3841 = vmatpush3.bf16.msra.mxu1 %v3840_v33  ;;  %v2814_v52 = vpop.f32.mrb[0].mxu0 }
 0x131   :  { %v2815_v56 = vpop.f32.mrb[1].mxu0  ;;  %3843 = vmatprep.subr.bf16.mxu1 %v3842_v44 }
 0x132   :  { %v2849_v7 = vpop.f32.mrb[0].mxu1  ;;  %v2816_v15 = vadd.f32 %v2815_v56, %v2814_v52  ;;  %3813 = vmatpush3.bf16.msra.mxu0 %v3812_v8 }
 0x133   :  { %v2850_v19 = vpop.f32.mrb[1].mxu1  ;;  %3815 = vmatprep.subr.bf16.mxu0 %v3814_v22 }
 0x134   :  { %v2851_v24 = vadd.f32 %v2850_v19, %v2849_v7  ;;  %3845 = vmatpush3.bf16.msra.mxu1 %v3844_v2 }
 0x135   :  { %3847 = vmatprep.subr.bf16.mxu1 %v3846_v31 }
 0x136   :  { %v1770_v1 = vadd.f32 %v2851_v24, %v2816_v15  ;;  %3817 = vmatpush3.bf16.msra.mxu0 %v3816_v11  ;;  %v2755_v24 = vstv %s5108_s2 }
 0x137   :  { %3819 = vmatprep.subr.bf16.mxu0 %v3818_v30 }
 0x138   :  { %3849 = vmatpush3.bf16.msra.mxu1 %v3848_v40 }
 0x139   :  { %3851 = vmatprep.subr.bf16.mxu1 %v3850_v42 }
 0x13a   :  { %3821 = vmatpush3.bf16.msra.mxu0 %v3820_v38 }
 0x13c   :  { %3853 = vmatpush3.bf16.msra.mxu1 %v3852_v26 }
 0x13d   :  { %2678 = vmatmul.mubr.f32.vlgmr.msra.gmra.mrb[14].mxu0 %v5078_v18 }
 0x13f   :  { %2748 = vmatmul.mubr.f32.vlgmr.msra.gmra.mrb[14].mxu1 %v5081_v4 }
 0x150   :  { %v2884_v5 = vpop.f32.mrb[2].mxu0 }
 0x151   :  { %v2885_v55 = vpop.f32.mrb[3].mxu0 }
 0x152   :  { %v2886_v27 = vadd.f32 %v2885_v55, %v2884_v5  ;;  %v2919_v53 = vpop.f32.mrb[2].mxu1 }
 0x153   :  { %v2920_v46 = vpop.f32.mrb[3].mxu1 }
 0x154   :  { %v1840_v54 = vadd.f32 %v2886_v27, %v1770_v1  ;;  %v2921_v51 = vadd.f32 %v2920_v46, %v2919_v53 }
 0x156   :  { %v1910_v62 = vadd.f32 %v2921_v51, %v1840_v54 }
 0x170   :  { %v2954_v39 = vpop.f32.mrb[4].mxu0 }
 0x171   :  { %v2955_v36 = vpop.f32.mrb[5].mxu0 }
 0x172   :  { %v2956_v0 = vadd.f32 %v2955_v36, %v2954_v39  ;;  %v2989_v12 = vpop.f32.mrb[4].mxu1 }
 0x173   :  { %v2990_v49 = vpop.f32.mrb[5].mxu1 }
 0x174   :  { %v1980_v43 = vadd.f32 %v2956_v0, %v1910_v62  ;;  %v2991_v28 = vadd.f32 %v2990_v49, %v2989_v12 }
 0x176   :  { %v2050_v29 = vadd.f32 %v2991_v28, %v1980_v43 }
 0x190   :  { %v3024_v50 = vpop.f32.mrb[6].mxu0 }
 0x191   :  { %v3025_v18 = vpop.f32.mrb[7].mxu0 }
 0x192   :  { %v3026_v59 = vadd.f32 %v3025_v18, %v3024_v50  ;;  %v3059_v4 = vpop.f32.mrb[6].mxu1 }
 0x193   :  { %v3060_v3 = vpop.f32.mrb[7].mxu1 }
 0x194   :  { %v2120_v21 = vadd.f32 %v3026_v59, %v2050_v29  ;;  %v3061_v41 = vadd.f32 %v3060_v3, %v3059_v4 }
 0x196   :  { %v2190_v14 = vadd.f32 %v3061_v41, %v2120_v21 }
 0x1b0   :  { %v3094_v63 = vpop.f32.mrb[8].mxu0 }
 0x1b1   :  { %v3095_v25 = vpop.f32.mrb[9].mxu0 }
 0x1b2   :  { %v3096_v60 = vadd.f32 %v3095_v25, %v3094_v63  ;;  %v3129_v33 = vpop.f32.mrb[8].mxu1 }
 0x1b3   :  { %v3130_v16 = vpop.f32.mrb[9].mxu1 }
 0x1b4   :  { %v2260_v32 = vadd.f32 %v3096_v60, %v2190_v14  ;;  %v3131_v44 = vadd.f32 %v3130_v16, %v3129_v33 }
 0x1b6   :  { %v2330_v17 = vadd.f32 %v3131_v44, %v2260_v32 }
 0x1d0   :  { %v3164_v10 = vpop.f32.mrb[10].mxu0 }
 0x1d1   :  { %v3165_v8 = vpop.f32.mrb[11].mxu0 }
 0x1d2   :  { %v3166_v34 = vadd.f32 %v3165_v8, %v3164_v10  ;;  %v3199_v58 = vpop.f32.mrb[10].mxu1 }
 0x1d3   :  { %v3200_v22 = vpop.f32.mrb[11].mxu1 }
 0x1d4   :  { %v2400_v13 = vadd.f32 %v3166_v34, %v2330_v17  ;;  %v3201_v45 = vadd.f32 %v3200_v22, %v3199_v58 }
 0x1d6   :  { %v2470_v52 = vadd.f32 %v3201_v45, %v2400_v13 }
 0x1f0   :  { %v3234_v2 = vpop.f32.mrb[12].mxu0 }
 0x1f1   :  { %v3235_v57 = vpop.f32.mrb[13].mxu0 }
 0x1f2   :  { %v3236_v23 = vadd.f32 %v3235_v57, %v3234_v2  ;;  %v3269_v56 = vpop.f32.mrb[12].mxu1 }
 0x1f3   :  { %v3270_v31 = vpop.f32.mrb[13].mxu1 }
 0x1f4   :  { %v2540_v20 = vadd.f32 %v3236_v23, %v2470_v52  ;;  %v3271_v6 = vadd.f32 %v3270_v31, %v3269_v56 }
 0x1f6   :  { %v2610_v7 = vadd.f32 %v3271_v6, %v2540_v20 }
 0x210   :  { %v3304_v15 = vpop.f32.mrb[14].mxu0 }
 0x211   :  { %v3305_v11 = vpop.f32.mrb[15].mxu0 }
 0x212   :  { %v3306_v61 = vadd.f32 %v3305_v11, %v3304_v15  ;;  %v3339_v37 = vpop.f32.mrb[14].mxu1 }
 0x213   :  { %v3340_v19 = vpop.f32.mrb[15].mxu1 }
 0x214   :  { %v2680_v30 = vadd.f32 %v3306_v61, %v2610_v7  ;;  %v3341_v9 = vadd.f32 %v3340_v19, %v3339_v37 }
 0x216   :  { %v2750_v47 = vadd.f32 %v3341_v9, %v2680_v30 }
 0x218   :  { %v2753_v40 = vmul.f32 0.125, %v2750_v47 }
 0x21a   :  { %v2756_v42 = vadd.f32 %v2755_v24, %v2753_v40 }
 0x21c   :  { %v2781_v35 = vmul.f32 -1.442695, %v2756_v42 }
 0x21e   :  { %3862 = vpow2.f32 %v2781_v35 }
 0x228   :  { %v3863_v48 = vpop.eup %3862 }
 0x229   :  { %v2760_v1 = vadd.f32 1.0, %v3863_v48 }
 0x22b   :  { %3864 = vrcp.f32 %v2760_v1 }
 0x235   :  { %v3865_v38 = vpop.eup %3864 }
 0x236   :  { %2764 = vst.msk [vmem:[#allocation9] sm:$0x3] %vm2763_vm4, %v3865_v38 }
 0x237   :  { %3921 = shalt.err (!%p3918_p6)
}
 0x238   :  { %s3922_s17 = scalar_lea.hbm %s5109_s3, 32 }
 0x239   :  { %p3923_p7 = scmp.ne.s32.totalorder %s5109_s3, %s3922_s17  ;;  %p3926_p8 = scmp.lt.u32.totalorder %s3922_s17, %s5109_s3 }
 0x23b   :  { %p3928_p9 = pnand %p3926_p8, %p3923_p7 }
 0x23d   :  { %3931 = shalt.err (!%p3928_p9)
}
 0x23e   :  { %2774 = dma.vmem_to_hbm [thread:$0]  %s2772_s14, 32, %s5109_s3, [#allocation6]  }
 0x23f   :  { %3936 = dma.done.wait [#allocation6], 32  }
 0x240   :  { %3937 = vsyncadd [#allocation6], 4294967264 }
 0x241   :  { %2778 = vsyncpa [#allocation5], 1 }
 0x242   :  { %2779 = vsyncpa [#allocation8], 1 }
 0x243   :  { %2780 = vsyncpa [#allocation6], 1 }

</bundles_post_ra>
